<compile_context>
chip_gen: v6e
topology: v6e:2x2x1
jax: 0.10.0
libtpu: 0.0.40
codegen_flags: <defaults>
</compile_context>

<pallas_src>
import math
import jax
import jax.numpy as jnp
from jax.experimental import pallas as pl
from jax.experimental.pallas import tpu as pltpu

D_MODEL = 32
N_HEAD = 8
HEAD_DIM = D_MODEL // N_HEAD
D_FF = 4 * D_MODEL
EPS = 1e-5  # nn.LayerNorm default

# ---- packed-slab lane offsets (all 128-aligned) -----------------------------
_WQ1, _WK1, _WV1, _WO1 = 0, 128, 256, 384
_WQ2, _WK2, _WV2, _WO2 = 512, 640, 768, 896
_W1, _W2T = 1024, 1152                      # w2 stored transposed: (D, D_FF)
_W_LANES = 1280

_LN1G, _LN1B, _LN3G, _LN3B = 0, 128, 256, 384
_BQ1, _BK1, _BV1, _BO1 = 512, 640, 768, 896
_BQ2, _BK2, _BV2, _BO2 = 1024, 1152, 1280, 1408
_B1, _B2 = 1536, 1664
_B_LANES = 1792


def _gelu(x):
    # TODO(synk): PyTorch nn.GELU defaults to the erf form; tanh approximation used
    # here (the in-file reference uses the same form, so the check is apples-to-apples).
    c = math.sqrt(2.0 / math.pi)
    return 0.5 * x * (1.0 + jnp.tanh(c * (x + 0.044715 * x * x * x)))


def decoder_block_kernel(x_ref, enc_ref, w_ref, b_ref, out_ref):
    B, T, D = x_ref.shape
    S = enc_ref.shape[1]

    x2 = x_ref[...].astype(jnp.float32).reshape(B * T, D)      # (B*T, D)
    enc2 = enc_ref[...].astype(jnp.float32).reshape(B * S, D)  # (B*S, D)

    # Per-head lane mask, built once: head h owns lanes [h*HEAD_DIM, (h+1)*HEAD_DIM).
    hh = jax.lax.broadcasted_iota(jnp.int32, (1, N_HEAD, 1, D), 1)
    dd = jax.lax.broadcasted_iota(jnp.int32, (1, N_HEAD, 1, D), 3)
    head_mask = jnp.logical_and(dd >= hh * HEAD_DIM,
                                dd < (hh + 1) * HEAD_DIM).astype(jnp.float32)

    # Causal mask built once (not once per head).
    row = jax.lax.broadcasted_iota(jnp.int32, (T, T), 0)
    col = jax.lax.broadcasted_iota(jnp.int32, (T, T), 1)
    causal = col <= row

    def bias(off, width):
        return b_ref[:, off:off + width]                        # (1, width), broadcasts

    def layer_norm(v, g_off, b_off):
        mu = jnp.mean(v, axis=-1, keepdims=True)
        var = jnp.mean((v - mu) ** 2, axis=-1, keepdims=True)
        return (v - mu) * jax.lax.rsqrt(var + EPS) * bias(g_off, D) + bias(b_off, D)

    def attention(q_in, kv_in, Tk, wq_o, bq_o, wk_o, bk_o, wv_o, bv_o, wo_o, bo_o,
                  mask):
        # q_in: (B*T, D) query-side input (softmax scale folded into Wq/bq).
        # kv_in: (B*Tk, D) key/value-side input.
        q = (jnp.dot(q_in, w_ref[:, wq_o:wq_o + D],
                     preferred_element_type=jnp.float32) + bias(bq_o, D)).reshape(B, T, D)
        k = (jnp.dot(kv_in, w_ref[:, wk_o:wk_o + D],
                     preferred_element_type=jnp.float32) + bias(bk_o, D)).reshape(B, Tk, D)
        v = (jnp.dot(kv_in, w_ref[:, wv_o:wv_o + D],
                     preferred_element_type=jnp.float32) + bias(bv_o, D)).reshape(B, Tk, D)

        # Replicate over a head axis and zero non-owned lanes -> (B*H, ., D).
        # The QK contraction over the full D then yields exactly the per-head score,
        # and per-head PV outputs land on disjoint lane ranges.
        qm = (q[:, None, :, :] * head_mask).reshape(B * N_HEAD, T, D)
        km = (k[:, None, :, :] * head_mask).reshape(B * N_HEAD, Tk, D)
        vm = (v[:, None, :, :] * head_mask).reshape(B * N_HEAD, Tk, D)

        s = jnp.einsum('nqd,nkd->nqk', qm, km,
                       preferred_element_type=jnp.float32)      # (B*H, T, Tk)
        if mask is not None:
            s = jnp.where(mask, s, -1e30)
        e = jnp.exp(s - jnp.max(s, axis=-1, keepdims=True))
        p = e * pl.reciprocal(jnp.sum(e, axis=-1, keepdims=True), approx=False)
        o = jnp.einsum('nqk,nkd->nqd', p, vm,
                       preferred_element_type=jnp.float32)      # (B*H, T, D)

        # Heads occupy disjoint 4-lane slices -> summing over the head axis just
        # reassembles the "concat heads" tensor (7 cheap VPU adds, no MXU chain).
        o4 = o.reshape(B, N_HEAD, T, D)
        heads = o4[:, 0]
        for h in range(1, N_HEAD):
            heads = heads + o4[:, h]
        heads = heads.reshape(B * T, D)

        return (jnp.dot(heads, w_ref[:, wo_o:wo_o + D],
                        preferred_element_type=jnp.float32) + bias(bo_o, D))

    # ---- X = X + attention1(Norm1(X))  (causal self-attention) -----------------
    n1 = layer_norm(x2, _LN1G, _LN1B)
    x2 = x2 + attention(n1, n1, T, _WQ1, _BQ1, _WK1, _BK1, _WV1, _BV1, _WO1, _BO1,
                        causal)

    # `x = self.Norm2(X)` in the PyTorch forward is dead code; its params are not
    # passed to the kernel at all, so nothing to compute here.

    # ---- X = X + attention2(X, en_output, en_output)  (cross-attention) --------
    # TODO(synk): src_mask is always None in this module's usage; masked
    # cross-attention is not wired.
    x2 = x2 + attention(x2, enc2, S, _WQ2, _BQ2, _WK2, _BK2, _WV2, _BV2, _WO2, _BO2,
                        None)

    # ---- X = X + MLP(Norm3(X)) --------------------------------------------------
    n3 = layer_norm(x2, _LN3G, _LN3B)
    hff = _gelu(jnp.dot(n3, w_ref[:, _W1:_W1 + D_FF],
                        preferred_element_type=jnp.float32) + bias(_B1, D_FF))
    x2 = x2 + (jnp.einsum('nf,df->nd', hff, w_ref[:, _W2T:_W2T + D_FF],
                          preferred_element_type=jnp.float32) + bias(_B2, D))

    out_ref[...] = x2.reshape(B, T, D).astype(out_ref.dtype)


def pack_params(params):
    """Fold the softmax scale into Wq/bq and pack everything into two slabs.
    Done once (outside the per-forward call path)."""
    (ln1_g, ln1_b, ln2_g, ln2_b, ln3_g, ln3_b,
     wq1, bq1, wk1, bk1, wv1, bv1, wo1, bo1,
     wq2, bq2, wk2, bk2, wv2, bv2, wo2, bo2,
     w1, b1, w2, b2) = params
    del ln2_g, ln2_b   # Norm2 output is unused in the original forward
    scale = 1.0 / math.sqrt(HEAD_DIM)

    def pad128(a):
        pad = (-a.shape[1]) % 128
        return jnp.pad(a, ((0, 0), (0, pad)))

    w_slab = jnp.concatenate(
        [pad128(wq1 * scale), pad128(wk1), pad128(wv1), pad128(wo1),
         pad128(wq2 * scale), pad128(wk2), pad128(wv2), pad128(wo2),
         pad128(w1), pad128(w2.T)], axis=1).astype(jnp.float32)
    b_slab = jnp.concatenate(
        [pad128(ln1_g), pad128(ln1_b), pad128(ln3_g), pad128(ln3_b),
         pad128(bq1 * scale), pad128(bk1), pad128(bv1), pad128(bo1),
         pad128(bq2 * scale), pad128(bk2), pad128(bv2), pad128(bo2),
         pad128(b1), pad128(b2)], axis=1).astype(jnp.float32)

    assert w_slab.shape == (D_MODEL, _W_LANES)
    assert b_slab.shape == (1, _B_LANES)
    return w_slab, b_slab


def decoder_block(x, enc, w_slab, b_slab):
    # Single-step kernel (no grid): at these shapes the whole working set is <1 MiB,
    # so everything lives in VMEM for one invocation with only 4 input DMAs.
    vmem = pl.BlockSpec(memory_space=pltpu.MemorySpace.VMEM)
    return pl.pallas_call(
        decoder_block_kernel,
        out_shape=jax.ShapeDtypeStruct(x.shape, x.dtype),
        in_specs=[vmem, vmem, vmem, vmem],
        out_specs=vmem,
    )(x, enc, w_slab, b_slab)


# ---------------- pure-JAX reference (same math, batched) ----------------
def reference(x, enc, params):
    (ln1_g, ln1_b, ln2_g, ln2_b, ln3_g, ln3_b,
     wq1, bq1, wk1, bk1, wv1, bv1, wo1, bo1,
     wq2, bq2, wk2, bk2, wv2, bv2, wo2, bo2,
     w1, b1, w2, b2) = params

    def ln(v, g, b):
        mu = jnp.mean(v, -1, keepdims=True)
        var = jnp.mean((v - mu) ** 2, -1, keepdims=True)
        return (v - mu) / jnp.sqrt(var + EPS) * g + b

    def mha(q_in, kv_in, wq, bq, wk, bk, wv, bv, wo, bo, causal):
        B, Tq, _ = q_in.shape
        Tk = kv_in.shape[1]
        q = (q_in @ wq + bq).reshape(B, Tq, N_HEAD, HEAD_DIM).transpose(0, 2, 1, 3)
        k = (kv_in @ wk + bk).reshape(B, Tk, N_HEAD, HEAD_DIM).transpose(0, 2, 1, 3)
        v = (kv_in @ wv + bv).reshape(B, Tk, N_HEAD, HEAD_DIM).transpose(0, 2, 1, 3)
        s = jnp.einsum('bhqd,bhkd->bhqk', q, k) / math.sqrt(HEAD_DIM)
        if causal:
            mask = jnp.tril(jnp.ones((Tq, Tk), bool))
            s = jnp.where(mask, s, -1e30)
        p = jax.nn.softmax(s, axis=-1)
        o = jnp.einsum('bhqk,bhkd->bhqd', p, v).transpose(0, 2, 1, 3)
        return o.reshape(B, Tq, D_MODEL) @ wo + bo

    x = x + mha(ln(x, ln1_g, ln1_b), ln(x, ln1_g, ln1_b),
                wq1, bq1, wk1, bk1, wv1, bv1, wo1, bo1, True)
    _ = ln(x, ln2_g, ln2_b)   # dead, as in the PyTorch forward
    x = x + mha(x, enc, wq2, bq2, wk2, bk2, wv2, bv2, wo2, bo2, False)
    n3 = ln(x, ln3_g, ln3_b)
    x = x + (_gelu(n3 @ w1 + b1) @ w2 + b2)
    return x


def init_params(key):
    ks = jax.random.split(key, 26)
    it = iter(ks)
    p = []
    # LayerNorm 1..3: gamma ~ 1, beta ~ 0 (perturbed so the LN params are exercised)
    for _ in range(3):
        p += [1.0 + 0.1 * jax.random.normal(next(it), (1, D_MODEL), jnp.float32),
              0.1 * jax.random.normal(next(it), (1, D_MODEL), jnp.float32)]
    # attention1 + attention2: q/k/v/o projections, (D, D) weight + (1, D) bias
    for _ in range(2):
        for _ in range(4):
            p += [0.05 * jax.random.normal(next(it), (D_MODEL, D_MODEL), jnp.float32),
                  0.05 * jax.random.normal(next(it), (1, D_MODEL), jnp.float32)]
    # MLP
    p += [0.05 * jax.random.normal(next(it), (D_MODEL, D_FF), jnp.float32),
          0.05 * jax.random.normal(next(it), (1, D_FF), jnp.float32),
          0.05 * jax.random.normal(next(it), (D_FF, D_MODEL), jnp.float32),
          0.05 * jax.random.normal(next(it), (1, D_MODEL), jnp.float32)]
    return p


if __name__ == "__main__":
    B, T, S = 2, 8, 8
    key = jax.random.PRNGKey(0)
    kx, ke, kp = jax.random.split(key, 3)
    x = jax.random.normal(kx, (B, T, D_MODEL), jnp.float32)
    enc = jax.random.normal(ke, (B, S, D_MODEL), jnp.float32)
    params = init_params(kp)

    # Pack once; reuse the slabs for every forward call.
    w_slab, b_slab = pack_params(params)
    w_slab, b_slab = jax.block_until_ready((w_slab, b_slab))

    out = decoder_block(x, enc, w_slab, b_slab)
    out = jax.block_until_ready(out)

    ref = reference(x, enc, params)
    assert out.shape == (B, T, D_MODEL)
    err = float(jnp.max(jnp.abs(out - ref)))
    assert jnp.allclose(out, ref, atol=1e-3, rtol=1e-3), f"max abs err {err}"
    print("KERNEL_OK")
</pallas_src>

<mosaic_0001>
module attributes {stable_mosaic.version = 11 : i64} {
  func.func @decoder_block_kernel(%arg0: memref<2x8x32xf32, #tpu.memory_space<vmem>>, %arg1: memref<2x8x32xf32, #tpu.memory_space<vmem>>, %arg2: memref<32x1280xf32, #tpu.memory_space<vmem>>, %arg3: memref<1x1792xf32, #tpu.memory_space<vmem>>, %arg4: memref<2x8x32xf32, #tpu.memory_space<vmem>>) attributes {dimension_semantics = [], scalar_prefetch = 0 : i64, scratch_operands = 0 : i64, tpu.core_type = #tpu.core_type<tc>} {
    %c0 = arith.constant 0 : index
    %c0_0 = arith.constant 0 : index
    %c0_1 = arith.constant 0 : index
    %0 = vector.load %arg0[%c0, %c0_0, %c0_1] : memref<2x8x32xf32, #tpu.memory_space<vmem>>, vector<2x8x32xf32>
    %1 = vector.shape_cast %0 : vector<2x8x32xf32> to vector<16x32xf32>
    %c0_2 = arith.constant 0 : index
    %c0_3 = arith.constant 0 : index
    %c0_4 = arith.constant 0 : index
    %2 = vector.load %arg1[%c0_2, %c0_3, %c0_4] : memref<2x8x32xf32, #tpu.memory_space<vmem>>, vector<2x8x32xf32>
    %3 = vector.shape_cast %2 : vector<2x8x32xf32> to vector<16x32xf32>
    %4 = tpu.iota {dimensions = array<i32: 1>} : vector<1x8x1x32xi32>
    %5 = tpu.iota {dimensions = array<i32: 3>} : vector<1x8x1x32xi32>
    %c4_i32 = arith.constant 4 : i32
    %6 = vector.broadcast %c4_i32 : i32 to vector<1x8x1x32xi32>
    %7 = arith.muli %4, %6 : vector<1x8x1x32xi32>
    %8 = arith.cmpi sge, %5, %7 : vector<1x8x1x32xi32>
    %c1_i32 = arith.constant 1 : i32
    %9 = vector.broadcast %c1_i32 : i32 to vector<1x8x1x32xi32>
    %10 = arith.addi %4, %9 : vector<1x8x1x32xi32>
    %c4_i32_5 = arith.constant 4 : i32
    %11 = vector.broadcast %c4_i32_5 : i32 to vector<1x8x1x32xi32>
    %12 = arith.muli %10, %11 : vector<1x8x1x32xi32>
    %13 = arith.cmpi slt, %5, %12 : vector<1x8x1x32xi32>
    %14 = arith.andi %8, %13 : vector<1x8x1x32xi1>
    %15 = arith.extui %14 : vector<1x8x1x32xi1> to vector<1x8x1x32xi32>
    %16 = arith.sitofp %15 : vector<1x8x1x32xi32> to vector<1x8x1x32xf32>
    %17 = tpu.iota {dimensions = array<i32: 0>} : vector<8x8xi32>
    %18 = tpu.iota {dimensions = array<i32: 1>} : vector<8x8xi32>
    %19 = arith.cmpi sle, %18, %17 : vector<8x8xi32>
    %cst = arith.constant dense<0.000000e+00> : vector<16xf32>
    %20 = vector.multi_reduction <add>, %1, %cst [1] : vector<16x32xf32> to vector<16xf32>
    %21 = vector.shape_cast %20 : vector<16xf32> to vector<16x1xf32>
    %cst_6 = arith.constant 3.200000e+01 : f32
    %22 = vector.broadcast %cst_6 : f32 to vector<16x1xf32>
    %23 = arith.divf %21, %22 : vector<16x1xf32>
    %24 = vector.broadcast %23 : vector<16x1xf32> to vector<16x32xf32>
    %25 = arith.subf %1, %24 : vector<16x32xf32>
    %26 = arith.mulf %25, %25 : vector<16x32xf32>
    %cst_7 = arith.constant dense<0.000000e+00> : vector<16xf32>
    %27 = vector.multi_reduction <add>, %26, %cst_7 [1] : vector<16x32xf32> to vector<16xf32>
    %28 = vector.shape_cast %27 : vector<16xf32> to vector<16x1xf32>
    %cst_8 = arith.constant 3.200000e+01 : f32
    %29 = vector.broadcast %cst_8 : f32 to vector<16x1xf32>
    %30 = arith.divf %28, %29 : vector<16x1xf32>
    %31 = vector.broadcast %23 : vector<16x1xf32> to vector<16x32xf32>
    %32 = arith.subf %1, %31 : vector<16x32xf32>
    %cst_9 = arith.constant 9.99999974E-6 : f32
    %33 = vector.broadcast %cst_9 : f32 to vector<16x1xf32>
    %34 = arith.addf %30, %33 : vector<16x1xf32>
    %35 = math.rsqrt %34 : vector<16x1xf32>
    %36 = vector.broadcast %35 : vector<16x1xf32> to vector<16x32xf32>
    %37 = arith.mulf %32, %36 : vector<16x32xf32>
    %c0_10 = arith.constant 0 : index
    %c0_11 = arith.constant 0 : index
    %38 = vector.load %arg3[%c0_10, %c0_11] : memref<1x1792xf32, #tpu.memory_space<vmem>>, vector<1x32xf32>
    %39 = vector.broadcast %38 : vector<1x32xf32> to vector<16x32xf32>
    %40 = arith.mulf %37, %39 : vector<16x32xf32>
    %c0_12 = arith.constant 0 : index
    %c128 = arith.constant 128 : index
    %41 = vector.load %arg3[%c0_12, %c128] : memref<1x1792xf32, #tpu.memory_space<vmem>>, vector<1x32xf32>
    %42 = vector.broadcast %41 : vector<1x32xf32> to vector<16x32xf32>
    %43 = arith.addf %40, %42 : vector<16x32xf32>
    %c0_13 = arith.constant 0 : index
    %c0_14 = arith.constant 0 : index
    %44 = vector.load %arg2[%c0_13, %c0_14] : memref<32x1280xf32, #tpu.memory_space<vmem>>, vector<32x32xf32>
    %cst_15 = arith.constant dense<0.000000e+00> : vector<16x32xf32>
    %45 = tpu.matmul %43, %44, %cst_15 {dimension_numbers = #tpu.dot_dimension_numbers<[1], [0], [0], [1], [0, 0, 1, 1], [], []>} : vector<16x32xf32>, vector<32x32xf32>, vector<16x32xf32> -> vector<16x32xf32>
    %c0_16 = arith.constant 0 : index
    %c512 = arith.constant 512 : index
    %46 = vector.load %arg3[%c0_16, %c512] : memref<1x1792xf32, #tpu.memory_space<vmem>>, vector<1x32xf32>
    %47 = vector.broadcast %46 : vector<1x32xf32> to vector<16x32xf32>
    %48 = arith.addf %45, %47 : vector<16x32xf32>
    %49 = vector.shape_cast %48 : vector<16x32xf32> to vector<2x8x32xf32>
    %c0_17 = arith.constant 0 : index
    %c128_18 = arith.constant 128 : index
    %50 = vector.load %arg2[%c0_17, %c128_18] : memref<32x1280xf32, #tpu.memory_space<vmem>>, vector<32x32xf32>
    %cst_19 = arith.constant dense<0.000000e+00> : vector<16x32xf32>
    %51 = tpu.matmul %43, %50, %cst_19 {dimension_numbers = #tpu.dot_dimension_numbers<[1], [0], [0], [1], [0, 0, 1, 1], [], []>} : vector<16x32xf32>, vector<32x32xf32>, vector<16x32xf32> -> vector<16x32xf32>
    %c0_20 = arith.constant 0 : index
    %c640 = arith.constant 640 : index
    %52 = vector.load %arg3[%c0_20, %c640] : memref<1x1792xf32, #tpu.memory_space<vmem>>, vector<1x32xf32>
    %53 = vector.broadcast %52 : vector<1x32xf32> to vector<16x32xf32>
    %54 = arith.addf %51, %53 : vector<16x32xf32>
    %55 = vector.shape_cast %54 : vector<16x32xf32> to vector<2x8x32xf32>
    %c0_21 = arith.constant 0 : index
    %c256 = arith.constant 256 : index
    %56 = vector.load %arg2[%c0_21, %c256] : memref<32x1280xf32, #tpu.memory_space<vmem>>, vector<32x32xf32>
    %cst_22 = arith.constant dense<0.000000e+00> : vector<16x32xf32>
    %57 = tpu.matmul %43, %56, %cst_22 {dimension_numbers = #tpu.dot_dimension_numbers<[1], [0], [0], [1], [0, 0, 1, 1], [], []>} : vector<16x32xf32>, vector<32x32xf32>, vector<16x32xf32> -> vector<16x32xf32>
    %c0_23 = arith.constant 0 : index
    %c768 = arith.constant 768 : index
    %58 = vector.load %arg3[%c0_23, %c768] : memref<1x1792xf32, #tpu.memory_space<vmem>>, vector<1x32xf32>
    %59 = vector.broadcast %58 : vector<1x32xf32> to vector<16x32xf32>
    %60 = arith.addf %57, %59 : vector<16x32xf32>
    %61 = vector.shape_cast %60 : vector<16x32xf32> to vector<2x8x32xf32>
    %62 = vector.shape_cast %49 : vector<2x8x32xf32> to vector<2x1x8x32xf32>
    %63 = vector.broadcast %62 : vector<2x1x8x32xf32> to vector<2x8x8x32xf32>
    %64 = vector.broadcast %16 : vector<1x8x1x32xf32> to vector<2x8x8x32xf32>
    %65 = arith.mulf %63, %64 : vector<2x8x8x32xf32>
    %66 = vector.shape_cast %65 : vector<2x8x8x32xf32> to vector<16x8x32xf32>
    %67 = vector.shape_cast %55 : vector<2x8x32xf32> to vector<2x1x8x32xf32>
    %68 = vector.broadcast %67 : vector<2x1x8x32xf32> to vector<2x8x8x32xf32>
    %69 = vector.broadcast %16 : vector<1x8x1x32xf32> to vector<2x8x8x32xf32>
    %70 = arith.mulf %68, %69 : vector<2x8x8x32xf32>
    %71 = vector.shape_cast %70 : vector<2x8x8x32xf32> to vector<16x8x32xf32>
    %72 = vector.shape_cast %61 : vector<2x8x32xf32> to vector<2x1x8x32xf32>
    %73 = vector.broadcast %72 : vector<2x1x8x32xf32> to vector<2x8x8x32xf32>
    %74 = vector.broadcast %16 : vector<1x8x1x32xf32> to vector<2x8x8x32xf32>
    %75 = arith.mulf %73, %74 : vector<2x8x8x32xf32>
    %76 = vector.shape_cast %75 : vector<2x8x8x32xf32> to vector<16x8x32xf32>
    "tpu.trace_start"() <{level = 10 : i32, message = "nqd,nkd->nqk"}> : () -> ()
    %cst_24 = arith.constant dense<0.000000e+00> : vector<16x8x8xf32>
    %77 = tpu.matmul %66, %71, %cst_24 {dimension_numbers = #tpu.dot_dimension_numbers<[2], [2], [1], [1], [0, 0, 0, 1, 1, 1], [0], [0]>} : vector<16x8x32xf32>, vector<16x8x32xf32>, vector<16x8x8xf32> -> vector<16x8x8xf32>
    %cst_25 = arith.constant -1.000000e+30 : f32
    "tpu.trace_stop"() : () -> ()
    %78 = vector.shape_cast %19 : vector<8x8xi1> to vector<1x8x8xi1>
    %79 = vector.broadcast %78 : vector<1x8x8xi1> to vector<16x8x8xi1>
    %80 = vector.broadcast %cst_25 : f32 to vector<16x8x8xf32>
    %81 = arith.select %79, %77, %80 : vector<16x8x8xi1>, vector<16x8x8xf32>
    %cst_26 = arith.constant dense<0xFF800000> : vector<16x8xf32>
    %82 = vector.multi_reduction <maximumf>, %81, %cst_26 [2] : vector<16x8x8xf32> to vector<16x8xf32>
    %83 = vector.shape_cast %82 : vector<16x8xf32> to vector<16x8x1xf32>
    %84 = vector.broadcast %83 : vector<16x8x1xf32> to vector<16x8x8xf32>
    %85 = arith.subf %81, %84 : vector<16x8x8xf32>
    %86 = math.exp %85 : vector<16x8x8xf32>
    %cst_27 = arith.constant dense<0.000000e+00> : vector<16x8xf32>
    %87 = vector.multi_reduction <add>, %86, %cst_27 [2] : vector<16x8x8xf32> to vector<16x8xf32>
    %88 = vector.shape_cast %87 : vector<16x8xf32> to vector<16x8x1xf32>
    %89 = tpu.reciprocal %88 : vector<16x8x1xf32> -> vector<16x8x1xf32>
    %90 = vector.broadcast %89 : vector<16x8x1xf32> to vector<16x8x8xf32>
    %91 = arith.mulf %86, %90 : vector<16x8x8xf32>
    "tpu.trace_start"() <{level = 10 : i32, message = "nqk,nkd->nqd"}> : () -> ()
    %cst_28 = arith.constant dense<0.000000e+00> : vector<16x8x32xf32>
    %92 = tpu.matmul %91, %76, %cst_28 {dimension_numbers = #tpu.dot_dimension_numbers<[2], [1], [1], [2], [0, 0, 0, 1, 1, 2], [0], [0]>} : vector<16x8x8xf32>, vector<16x8x32xf32>, vector<16x8x32xf32> -> vector<16x8x32xf32>
    "tpu.trace_stop"() : () -> ()
    %93 = vector.shape_cast %92 : vector<16x8x32xf32> to vector<2x8x8x32xf32>
    %94 = vector.extract_strided_slice %93 {offsets = [0, 0, 0, 0], sizes = [2, 1, 8, 32], strides = [1, 1, 1, 1]} : vector<2x8x8x32xf32> to vector<2x1x8x32xf32>
    %95 = vector.shape_cast %94 : vector<2x1x8x32xf32> to vector<2x8x32xf32>
    %96 = vector.extract_strided_slice %93 {offsets = [0, 1, 0, 0], sizes = [2, 1, 8, 32], strides = [1, 1, 1, 1]} : vector<2x8x8x32xf32> to vector<2x1x8x32xf32>
    %97 = vector.shape_cast %96 : vector<2x1x8x32xf32> to vector<2x8x32xf32>
    %98 = arith.addf %95, %97 : vector<2x8x32xf32>
    %99 = vector.extract_strided_slice %93 {offsets = [0, 2, 0, 0], sizes = [2, 1, 8, 32], strides = [1, 1, 1, 1]} : vector<2x8x8x32xf32> to vector<2x1x8x32xf32>
    %100 = vector.shape_cast %99 : vector<2x1x8x32xf32> to vector<2x8x32xf32>
    %101 = arith.addf %98, %100 : vector<2x8x32xf32>
    %102 = vector.extract_strided_slice %93 {offsets = [0, 3, 0, 0], sizes = [2, 1, 8, 32], strides = [1, 1, 1, 1]} : vector<2x8x8x32xf32> to vector<2x1x8x32xf32>
    %103 = vector.shape_cast %102 : vector<2x1x8x32xf32> to vector<2x8x32xf32>
    %104 = arith.addf %101, %103 : vector<2x8x32xf32>
    %105 = vector.extract_strided_slice %93 {offsets = [0, 4, 0, 0], sizes = [2, 1, 8, 32], strides = [1, 1, 1, 1]} : vector<2x8x8x32xf32> to vector<2x1x8x32xf32>
    %106 = vector.shape_cast %105 : vector<2x1x8x32xf32> to vector<2x8x32xf32>
    %107 = arith.addf %104, %106 : vector<2x8x32xf32>
    %108 = vector.extract_strided_slice %93 {offsets = [0, 5, 0, 0], sizes = [2, 1, 8, 32], strides = [1, 1, 1, 1]} : vector<2x8x8x32xf32> to vector<2x1x8x32xf32>
    %109 = vector.shape_cast %108 : vector<2x1x8x32xf32> to vector<2x8x32xf32>
    %110 = arith.addf %107, %109 : vector<2x8x32xf32>
    %111 = vector.extract_strided_slice %93 {offsets = [0, 6, 0, 0], sizes = [2, 1, 8, 32], strides = [1, 1, 1, 1]} : vector<2x8x8x32xf32> to vector<2x1x8x32xf32>
    %112 = vector.shape_cast %111 : vector<2x1x8x32xf32> to vector<2x8x32xf32>
    %113 = arith.addf %110, %112 : vector<2x8x32xf32>
    %114 = vector.extract_strided_slice %93 {offsets = [0, 7, 0, 0], sizes = [2, 1, 8, 32], strides = [1, 1, 1, 1]} : vector<2x8x8x32xf32> to vector<2x1x8x32xf32>
    %115 = vector.shape_cast %114 : vector<2x1x8x32xf32> to vector<2x8x32xf32>
    %116 = arith.addf %113, %115 : vector<2x8x32xf32>
    %117 = vector.shape_cast %116 : vector<2x8x32xf32> to vector<16x32xf32>
    %c0_29 = arith.constant 0 : index
    %c384 = arith.constant 384 : index
    %118 = vector.load %arg2[%c0_29, %c384] : memref<32x1280xf32, #tpu.memory_space<vmem>>, vector<32x32xf32>
    %cst_30 = arith.constant dense<0.000000e+00> : vector<16x32xf32>
    %119 = tpu.matmul %117, %118, %cst_30 {dimension_numbers = #tpu.dot_dimension_numbers<[1], [0], [0], [1], [0, 0, 1, 1], [], []>} : vector<16x32xf32>, vector<32x32xf32>, vector<16x32xf32> -> vector<16x32xf32>
    %c0_31 = arith.constant 0 : index
    %c896 = arith.constant 896 : index
    %120 = vector.load %arg3[%c0_31, %c896] : memref<1x1792xf32, #tpu.memory_space<vmem>>, vector<1x32xf32>
    %121 = vector.broadcast %120 : vector<1x32xf32> to vector<16x32xf32>
    %122 = arith.addf %119, %121 : vector<16x32xf32>
    %123 = arith.addf %1, %122 : vector<16x32xf32>
    %c0_32 = arith.constant 0 : index
    %c512_33 = arith.constant 512 : index
    %124 = vector.load %arg2[%c0_32, %c512_33] : memref<32x1280xf32, #tpu.memory_space<vmem>>, vector<32x32xf32>
    %cst_34 = arith.constant dense<0.000000e+00> : vector<16x32xf32>
    %125 = tpu.matmul %123, %124, %cst_34 {dimension_numbers = #tpu.dot_dimension_numbers<[1], [0], [0], [1], [0, 0, 1, 1], [], []>} : vector<16x32xf32>, vector<32x32xf32>, vector<16x32xf32> -> vector<16x32xf32>
    %c0_35 = arith.constant 0 : index
    %c1024 = arith.constant 1024 : index
    %126 = vector.load %arg3[%c0_35, %c1024] : memref<1x1792xf32, #tpu.memory_space<vmem>>, vector<1x32xf32>
    %127 = vector.broadcast %126 : vector<1x32xf32> to vector<16x32xf32>
    %128 = arith.addf %125, %127 : vector<16x32xf32>
    %129 = vector.shape_cast %128 : vector<16x32xf32> to vector<2x8x32xf32>
    %c0_36 = arith.constant 0 : index
    %c640_37 = arith.constant 640 : index
    %130 = vector.load %arg2[%c0_36, %c640_37] : memref<32x1280xf32, #tpu.memory_space<vmem>>, vector<32x32xf32>
    %cst_38 = arith.constant dense<0.000000e+00> : vector<16x32xf32>
    %131 = tpu.matmul %3, %130, %cst_38 {dimension_numbers = #tpu.dot_dimension_numbers<[1], [0], [0], [1], [0, 0, 1, 1], [], []>} : vector<16x32xf32>, vector<32x32xf32>, vector<16x32xf32> -> vector<16x32xf32>
    %c0_39 = arith.constant 0 : index
    %c1152 = arith.constant 1152 : index
    %132 = vector.load %arg3[%c0_39, %c1152] : memref<1x1792xf32, #tpu.memory_space<vmem>>, vector<1x32xf32>
    %133 = vector.broadcast %132 : vector<1x32xf32> to vector<16x32xf32>
    %134 = arith.addf %131, %133 : vector<16x32xf32>
    %135 = vector.shape_cast %134 : vector<16x32xf32> to vector<2x8x32xf32>
    %c0_40 = arith.constant 0 : index
    %c768_41 = arith.constant 768 : index
    %136 = vector.load %arg2[%c0_40, %c768_41] : memref<32x1280xf32, #tpu.memory_space<vmem>>, vector<32x32xf32>
    %cst_42 = arith.constant dense<0.000000e+00> : vector<16x32xf32>
    %137 = tpu.matmul %3, %136, %cst_42 {dimension_numbers = #tpu.dot_dimension_numbers<[1], [0], [0], [1], [0, 0, 1, 1], [], []>} : vector<16x32xf32>, vector<32x32xf32>, vector<16x32xf32> -> vector<16x32xf32>
    %c0_43 = arith.constant 0 : index
    %c1280 = arith.constant 1280 : index
    %138 = vector.load %arg3[%c0_43, %c1280] : memref<1x1792xf32, #tpu.memory_space<vmem>>, vector<1x32xf32>
    %139 = vector.broadcast %138 : vector<1x32xf32> to vector<16x32xf32>
    %140 = arith.addf %137, %139 : vector<16x32xf32>
    %141 = vector.shape_cast %140 : vector<16x32xf32> to vector<2x8x32xf32>
    %142 = vector.shape_cast %129 : vector<2x8x32xf32> to vector<2x1x8x32xf32>
    %143 = vector.broadcast %142 : vector<2x1x8x32xf32> to vector<2x8x8x32xf32>
    %144 = vector.broadcast %16 : vector<1x8x1x32xf32> to vector<2x8x8x32xf32>
    %145 = arith.mulf %143, %144 : vector<2x8x8x32xf32>
    %146 = vector.shape_cast %145 : vector<2x8x8x32xf32> to vector<16x8x32xf32>
    %147 = vector.shape_cast %135 : vector<2x8x32xf32> to vector<2x1x8x32xf32>
    %148 = vector.broadcast %147 : vector<2x1x8x32xf32> to vector<2x8x8x32xf32>
    %149 = vector.broadcast %16 : vector<1x8x1x32xf32> to vector<2x8x8x32xf32>
    %150 = arith.mulf %148, %149 : vector<2x8x8x32xf32>
    %151 = vector.shape_cast %150 : vector<2x8x8x32xf32> to vector<16x8x32xf32>
    %152 = vector.shape_cast %141 : vector<2x8x32xf32> to vector<2x1x8x32xf32>
    %153 = vector.broadcast %152 : vector<2x1x8x32xf32> to vector<2x8x8x32xf32>
    %154 = vector.broadcast %16 : vector<1x8x1x32xf32> to vector<2x8x8x32xf32>
    %155 = arith.mulf %153, %154 : vector<2x8x8x32xf32>
    %156 = vector.shape_cast %155 : vector<2x8x8x32xf32> to vector<16x8x32xf32>
    "tpu.trace_start"() <{level = 10 : i32, message = "nqd,nkd->nqk"}> : () -> ()
    %cst_44 = arith.constant dense<0.000000e+00> : vector<16x8x8xf32>
    %157 = tpu.matmul %146, %151, %cst_44 {dimension_numbers = #tpu.dot_dimension_numbers<[2], [2], [1], [1], [0, 0, 0, 1, 1, 1], [0], [0]>} : vector<16x8x32xf32>, vector<16x8x32xf32>, vector<16x8x8xf32> -> vector<16x8x8xf32>
    "tpu.trace_stop"() : () -> ()
    %cst_45 = arith.constant dense<0xFF800000> : vector<16x8xf32>
    %158 = vector.multi_reduction <maximumf>, %157, %cst_45 [2] : vector<16x8x8xf32> to vector<16x8xf32>
    %159 = vector.shape_cast %158 : vector<16x8xf32> to vector<16x8x1xf32>
    %160 = vector.broadcast %159 : vector<16x8x1xf32> to vector<16x8x8xf32>
    %161 = arith.subf %157, %160 : vector<16x8x8xf32>
    %162 = math.exp %161 : vector<16x8x8xf32>
    %cst_46 = arith.constant dense<0.000000e+00> : vector<16x8xf32>
    %163 = vector.multi_reduction <add>, %162, %cst_46 [2] : vector<16x8x8xf32> to vector<16x8xf32>
    %164 = vector.shape_cast %163 : vector<16x8xf32> to vector<16x8x1xf32>
    %165 = tpu.reciprocal %164 : vector<16x8x1xf32> -> vector<16x8x1xf32>
    %166 = vector.broadcast %165 : vector<16x8x1xf32> to vector<16x8x8xf32>
    %167 = arith.mulf %162, %166 : vector<16x8x8xf32>
    "tpu.trace_start"() <{level = 10 : i32, message = "nqk,nkd->nqd"}> : () -> ()
    %cst_47 = arith.constant dense<0.000000e+00> : vector<16x8x32xf32>
    %168 = tpu.matmul %167, %156, %cst_47 {dimension_numbers = #tpu.dot_dimension_numbers<[2], [1], [1], [2], [0, 0, 0, 1, 1, 2], [0], [0]>} : vector<16x8x8xf32>, vector<16x8x32xf32>, vector<16x8x32xf32> -> vector<16x8x32xf32>
    "tpu.trace_stop"() : () -> ()
    %169 = vector.shape_cast %168 : vector<16x8x32xf32> to vector<2x8x8x32xf32>
    %170 = vector.extract_strided_slice %169 {offsets = [0, 0, 0, 0], sizes = [2, 1, 8, 32], strides = [1, 1, 1, 1]} : vector<2x8x8x32xf32> to vector<2x1x8x32xf32>
    %171 = vector.shape_cast %170 : vector<2x1x8x32xf32> to vector<2x8x32xf32>
    %172 = vector.extract_strided_slice %169 {offsets = [0, 1, 0, 0], sizes = [2, 1, 8, 32], strides = [1, 1, 1, 1]} : vector<2x8x8x32xf32> to vector<2x1x8x32xf32>
    %173 = vector.shape_cast %172 : vector<2x1x8x32xf32> to vector<2x8x32xf32>
    %174 = arith.addf %171, %173 : vector<2x8x32xf32>
    %175 = vector.extract_strided_slice %169 {offsets = [0, 2, 0, 0], sizes = [2, 1, 8, 32], strides = [1, 1, 1, 1]} : vector<2x8x8x32xf32> to vector<2x1x8x32xf32>
    %176 = vector.shape_cast %175 : vector<2x1x8x32xf32> to vector<2x8x32xf32>
    %177 = arith.addf %174, %176 : vector<2x8x32xf32>
    %178 = vector.extract_strided_slice %169 {offsets = [0, 3, 0, 0], sizes = [2, 1, 8, 32], strides = [1, 1, 1, 1]} : vector<2x8x8x32xf32> to vector<2x1x8x32xf32>
    %179 = vector.shape_cast %178 : vector<2x1x8x32xf32> to vector<2x8x32xf32>
    %180 = arith.addf %177, %179 : vector<2x8x32xf32>
    %181 = vector.extract_strided_slice %169 {offsets = [0, 4, 0, 0], sizes = [2, 1, 8, 32], strides = [1, 1, 1, 1]} : vector<2x8x8x32xf32> to vector<2x1x8x32xf32>
    %182 = vector.shape_cast %181 : vector<2x1x8x32xf32> to vector<2x8x32xf32>
    %183 = arith.addf %180, %182 : vector<2x8x32xf32>
    %184 = vector.extract_strided_slice %169 {offsets = [0, 5, 0, 0], sizes = [2, 1, 8, 32], strides = [1, 1, 1, 1]} : vector<2x8x8x32xf32> to vector<2x1x8x32xf32>
    %185 = vector.shape_cast %184 : vector<2x1x8x32xf32> to vector<2x8x32xf32>
    %186 = arith.addf %183, %185 : vector<2x8x32xf32>
    %187 = vector.extract_strided_slice %169 {offsets = [0, 6, 0, 0], sizes = [2, 1, 8, 32], strides = [1, 1, 1, 1]} : vector<2x8x8x32xf32> to vector<2x1x8x32xf32>
    %188 = vector.shape_cast %187 : vector<2x1x8x32xf32> to vector<2x8x32xf32>
    %189 = arith.addf %186, %188 : vector<2x8x32xf32>
    %190 = vector.extract_strided_slice %169 {offsets = [0, 7, 0, 0], sizes = [2, 1, 8, 32], strides = [1, 1, 1, 1]} : vector<2x8x8x32xf32> to vector<2x1x8x32xf32>
    %191 = vector.shape_cast %190 : vector<2x1x8x32xf32> to vector<2x8x32xf32>
    %192 = arith.addf %189, %191 : vector<2x8x32xf32>
    %193 = vector.shape_cast %192 : vector<2x8x32xf32> to vector<16x32xf32>
    %c0_48 = arith.constant 0 : index
    %c896_49 = arith.constant 896 : index
    %194 = vector.load %arg2[%c0_48, %c896_49] : memref<32x1280xf32, #tpu.memory_space<vmem>>, vector<32x32xf32>
    %cst_50 = arith.constant dense<0.000000e+00> : vector<16x32xf32>
    %195 = tpu.matmul %193, %194, %cst_50 {dimension_numbers = #tpu.dot_dimension_numbers<[1], [0], [0], [1], [0, 0, 1, 1], [], []>} : vector<16x32xf32>, vector<32x32xf32>, vector<16x32xf32> -> vector<16x32xf32>
    %c0_51 = arith.constant 0 : index
    %c1408 = arith.constant 1408 : index
    %196 = vector.load %arg3[%c0_51, %c1408] : memref<1x1792xf32, #tpu.memory_space<vmem>>, vector<1x32xf32>
    %197 = vector.broadcast %196 : vector<1x32xf32> to vector<16x32xf32>
    %198 = arith.addf %195, %197 : vector<16x32xf32>
    %199 = arith.addf %123, %198 : vector<16x32xf32>
    %cst_52 = arith.constant dense<0.000000e+00> : vector<16xf32>
    %200 = vector.multi_reduction <add>, %199, %cst_52 [1] : vector<16x32xf32> to vector<16xf32>
    %201 = vector.shape_cast %200 : vector<16xf32> to vector<16x1xf32>
    %cst_53 = arith.constant 3.200000e+01 : f32
    %202 = vector.broadcast %cst_53 : f32 to vector<16x1xf32>
    %203 = arith.divf %201, %202 : vector<16x1xf32>
    %204 = vector.broadcast %203 : vector<16x1xf32> to vector<16x32xf32>
    %205 = arith.subf %199, %204 : vector<16x32xf32>
    %206 = arith.mulf %205, %205 : vector<16x32xf32>
    %cst_54 = arith.constant dense<0.000000e+00> : vector<16xf32>
    %207 = vector.multi_reduction <add>, %206, %cst_54 [1] : vector<16x32xf32> to vector<16xf32>
    %208 = vector.shape_cast %207 : vector<16xf32> to vector<16x1xf32>
    %cst_55 = arith.constant 3.200000e+01 : f32
    %209 = vector.broadcast %cst_55 : f32 to vector<16x1xf32>
    %210 = arith.divf %208, %209 : vector<16x1xf32>
    %211 = vector.broadcast %203 : vector<16x1xf32> to vector<16x32xf32>
    %212 = arith.subf %199, %211 : vector<16x32xf32>
    %cst_56 = arith.constant 9.99999974E-6 : f32
    %213 = vector.broadcast %cst_56 : f32 to vector<16x1xf32>
    %214 = arith.addf %210, %213 : vector<16x1xf32>
    %215 = math.rsqrt %214 : vector<16x1xf32>
    %216 = vector.broadcast %215 : vector<16x1xf32> to vector<16x32xf32>
    %217 = arith.mulf %212, %216 : vector<16x32xf32>
    %c0_57 = arith.constant 0 : index
    %c256_58 = arith.constant 256 : index
    %218 = vector.load %arg3[%c0_57, %c256_58] : memref<1x1792xf32, #tpu.memory_space<vmem>>, vector<1x32xf32>
    %219 = vector.broadcast %218 : vector<1x32xf32> to vector<16x32xf32>
    %220 = arith.mulf %217, %219 : vector<16x32xf32>
    %c0_59 = arith.constant 0 : index
    %c384_60 = arith.constant 384 : index
    %221 = vector.load %arg3[%c0_59, %c384_60] : memref<1x1792xf32, #tpu.memory_space<vmem>>, vector<1x32xf32>
    %222 = vector.broadcast %221 : vector<1x32xf32> to vector<16x32xf32>
    %223 = arith.addf %220, %222 : vector<16x32xf32>
    %c0_61 = arith.constant 0 : index
    %c1024_62 = arith.constant 1024 : index
    %224 = vector.load %arg2[%c0_61, %c1024_62] : memref<32x1280xf32, #tpu.memory_space<vmem>>, vector<32x128xf32>
    %cst_63 = arith.constant dense<0.000000e+00> : vector<16x128xf32>
    %225 = tpu.matmul %223, %224, %cst_63 {dimension_numbers = #tpu.dot_dimension_numbers<[1], [0], [0], [1], [0, 0, 1, 1], [], []>} : vector<16x32xf32>, vector<32x128xf32>, vector<16x128xf32> -> vector<16x128xf32>
    %c0_64 = arith.constant 0 : index
    %c1536 = arith.constant 1536 : index
    %226 = vector.load %arg3[%c0_64, %c1536] : memref<1x1792xf32, #tpu.memory_space<vmem>>, vector<1x128xf32>
    %227 = vector.broadcast %226 : vector<1x128xf32> to vector<16x128xf32>
    %228 = arith.addf %225, %227 : vector<16x128xf32>
    %cst_65 = arith.constant 5.000000e-01 : f32
    %229 = vector.broadcast %cst_65 : f32 to vector<16x128xf32>
    %230 = arith.mulf %229, %228 : vector<16x128xf32>
    %cst_66 = arith.constant 4.471500e-02 : f32
    %231 = vector.broadcast %cst_66 : f32 to vector<16x128xf32>
    %232 = arith.mulf %231, %228 : vector<16x128xf32>
    %233 = arith.mulf %232, %228 : vector<16x128xf32>
    %234 = arith.mulf %233, %228 : vector<16x128xf32>
    %235 = arith.addf %228, %234 : vector<16x128xf32>
    %cst_67 = arith.constant 0.797884583 : f32
    %236 = vector.broadcast %cst_67 : f32 to vector<16x128xf32>
    %237 = arith.mulf %236, %235 : vector<16x128xf32>
    %238 = math.tanh %237 : vector<16x128xf32>
    %cst_68 = arith.constant 1.000000e+00 : f32
    %239 = vector.broadcast %cst_68 : f32 to vector<16x128xf32>
    %240 = arith.addf %239, %238 : vector<16x128xf32>
    %241 = arith.mulf %230, %240 : vector<16x128xf32>
    %c0_69 = arith.constant 0 : index
    %c1152_70 = arith.constant 1152 : index
    %242 = vector.load %arg2[%c0_69, %c1152_70] : memref<32x1280xf32, #tpu.memory_space<vmem>>, vector<32x128xf32>
    "tpu.trace_start"() <{level = 10 : i32, message = "nf,df->nd"}> : () -> ()
    %cst_71 = arith.constant dense<0.000000e+00> : vector<16x32xf32>
    %243 = tpu.matmul %241, %242, %cst_71 {dimension_numbers = #tpu.dot_dimension_numbers<[1], [1], [0], [0], [0, 0, 1, 0], [], []>} : vector<16x128xf32>, vector<32x128xf32>, vector<16x32xf32> -> vector<16x32xf32>
    "tpu.trace_stop"() : () -> ()
    %c0_72 = arith.constant 0 : index
    %c1664 = arith.constant 1664 : index
    %244 = vector.load %arg3[%c0_72, %c1664] : memref<1x1792xf32, #tpu.memory_space<vmem>>, vector<1x32xf32>
    %245 = vector.broadcast %244 : vector<1x32xf32> to vector<16x32xf32>
    %246 = arith.addf %243, %245 : vector<16x32xf32>
    %247 = arith.addf %199, %246 : vector<16x32xf32>
    %248 = vector.shape_cast %247 : vector<16x32xf32> to vector<2x8x32xf32>
    %c0_73 = arith.constant 0 : index
    %c0_74 = arith.constant 0 : index
    %c0_75 = arith.constant 0 : index
    %249 = vector.load %arg4[%c0_73, %c0_74, %c0_75] : memref<2x8x32xf32, #tpu.memory_space<vmem>>, vector<2x8x32xf32>
    tpu.vector_store %arg4[%c0_73, %c0_74, %c0_75], %248 {strides = array<i32>} : memref<2x8x32xf32, #tpu.memory_space<vmem>>, vector<2x8x32xf32>,
    return
  }
}

</mosaic_0001>

<bundles_post_ra>
// kernel: tpu_custom_call.1
= control target key start
LH: loop header
LB: loop body
LE: loop exit
PB: predicated region body
PF: predicated region fallthrough
CT: control target
= control target key end

     0   :  { %9 = vsyncpa [#allocation3], 0  ;;  %s8417_s0 = inlined_call_operand.hbm [shape: f32[2,8,32], index: 0, kind: input, shape index: {}]   ;;  %s8418_s1 = inlined_call_operand.hbm [shape: f32[2,8,32], index: 1, kind: input, shape index: {}]   ;;  %s8419_s2 = inlined_call_operand.hbm [shape: f32[32,1280], index: 2, kind: input, shape index: {}]   ;;  %s8420_s3 = inlined_call_operand.hbm [shape: f32[1,1792], index: 3, kind: input, shape index: {}]   ;;  %s8421_s4 = inlined_call_operand.hbm [shape: f32[2,8,32], index: 4, kind: output, shape index: {}]  }
   0x1   :  { %10 = vsyncpa [#allocation6], 0 }
   0x2   :  { %11 = vsyncpa [#allocation9], 0 }
   0x3   :  { %12 = vsyncpa [#allocation4], 0  ;;  %s7429_s15 = smov [#allocation5]   ;;  %s7430_s17 = smov [#allocation2]  }
   0x4   :  { %s30_s16 = sshll.u32 %s7429_s15, 4  ;;  %s18_s18 = sshll.u32 %s7430_s17, 4  ;;  %s31_s16 = int_to_ptr.vmem [resolvable:$true] %s30_s16  ;;  %s19_s18 = int_to_ptr.vmem [resolvable:$true] %s18_s18 }
   0x5   :  { %s7329_s19 = scalar_lea.vmem %s31_s16, 256  ;;  %p7334_p1 = scmp.lt.s32.totalorder %s31_s16, %s31_s16 }
   0x6   :  { %p7330_p0 = scmp.ne.s32.totalorder %s31_s16, %s7329_s19  ;;  %p7335_p2 = scmp.lt.s32.totalorder %s7329_s19, %s7329_s19 }
   0x8   :  { %p7336_p3 = por %p7335_p2, %p7334_p1 }
   0xa   :  { %p7337_p4 = pnand %p7336_p3, %p7330_p0 }
   0xc   :  { %7340 = shalt.err (!%p7337_p4)
}
   0xd   :  { %s7431_s20 = smov 128   ;;  %s7432_s21 = smov 8  }
   0xe   :  { %36 = dma.hbm_to_vmem [thread:$0]  %s8418_s1, 256, %s31_s16, [#allocation6], %s7431_s20, %s7431_s20, %s7432_s21  }
   0xf   :  { %s7349_s24 = scalar_lea.vmem %s19_s18, 256  ;;  %p7354_p6 = scmp.lt.s32.totalorder %s19_s18, %s19_s18 }
  0x10   :  { %p7350_p5 = scmp.ne.s32.totalorder %s19_s18, %s7349_s24  ;;  %p7355_p7 = scmp.lt.s32.totalorder %s7349_s24, %s7349_s24 }
  0x12   :  { %p7356_p8 = por %p7355_p7, %p7354_p6 }
  0x14   :  { %p7357_p9 = pnand %p7356_p8, %p7350_p5 }
  0x16   :  { %7360 = shalt.err (!%p7357_p9)
}
  0x17   :  { %24 = dma.hbm_to_vmem [thread:$0]  %s8417_s0, 256, %s19_s18, [#allocation3], %s7431_s20, %s7431_s20, %s7432_s21  }
  0x18   :  { %s7433_s27 = smov [#allocation7]  }
  0x19   :  { %s42_s28 = sshll.u32 %s7433_s27, 4  ;;  %s43_s28 = int_to_ptr.vmem [resolvable:$true] %s42_s28 }
  0x1a   :  { %s7369_s29 = scalar_lea.vmem %s43_s28, 5120  ;;  %p7374_p11 = scmp.lt.s32.totalorder %s43_s28, %s43_s28 }
  0x1b   :  { %p7370_p10 = scmp.ne.s32.totalorder %s43_s28, %s7369_s29  ;;  %p7375_p12 = scmp.lt.s32.totalorder %s7369_s29, %s7369_s29 }
  0x1d   :  { %p7376_p13 = por %p7375_p12, %p7374_p11 }
  0x1f   :  { %p7377_p0 = pnand %p7376_p13, %p7370_p10 }
  0x21   :  { %7380 = shalt.err (!%p7377_p0)
}
  0x22   :  { %s7434_s1 = smov 1280   ;;  %s7435_s30 = smov 80  }
  0x23   :  { %48 = dma.hbm_to_vmem [thread:$0]  %s8419_s2, 5120, %s43_s28, [#allocation6], %s7434_s1, %s7434_s1, %s7435_s30  }
  0x24   :  { %s7436_s7 = smov [#allocation8]  }
  0x25   :  { %s55_s8 = sshll.u32 %s7436_s7, 4  ;;  %s56_s8 = int_to_ptr.vmem [resolvable:$true] %s55_s8 }
  0x26   :  { %s7389_s0 = scalar_lea.vmem %s56_s8, 224  ;;  %p7394_p2 = scmp.lt.s32.totalorder %s56_s8, %s56_s8 }
  0x27   :  { %p7390_p1 = scmp.ne.s32.totalorder %s56_s8, %s7389_s0  ;;  %p7395_p3 = scmp.lt.s32.totalorder %s7389_s0, %s7389_s0 }
  0x29   :  { %p7396_p4 = por %p7395_p3, %p7394_p2 }
  0x2b   :  { %p7397_p5 = pnand %p7396_p4, %p7390_p1 }
  0x2d   :  { %7400 = shalt.err (!%p7397_p5)
}
  0x2e   :  { %58 = dma.hbm_to_vmem [thread:$0]  %s8420_s3, 224, %s56_s8, [#allocation9]  }
  0x2f   :  { %7421 = dma.done.wait [#allocation3], 256  }
  0x30   :  { %7422 = vsyncadd [#allocation3], 4294967040 }
  0x31   :  { %7423 = dma.done.wait [#allocation6], 5376  }
  0x32   :  { %7424 = vsyncadd [#allocation6], 4294961920 }
  0x33   :  { %7425 = dma.done.wait [#allocation9], 224  }
  0x34   :  { %7426 = vsyncadd [#allocation9], 4294967072  ;;  %vm120_vm0 = vcmask 261120   ;;  %v71_v0 = vld [vmem:[#allocation2] sm:$0xff]  ;;  %v72_v1 = vld [vmem:[#allocation2 + $0x8] sm:$0xff]  ;;  %v7437_v42 = vmov 0.0   ;;  %v75_v43 = vlaneseq }
  0x35   :  { %v121_v2 = vsel %vm120_vm0, %v71_v0, 0.0  ;;  %v124_v3 = vsel %vm120_vm0, %v72_v1, 0.0  ;;  %v169_v14 = vld [vmem:[#allocation7 + $0xf0] sm:$0xff]  ;;  %v347_v15 = vld [vmem:[#allocation7 + $0x100] sm:$0xff]  ;;  %v261_v22 = vld [vmem:[#allocation7 + $0xf8] sm:$0xff]  ;;  %vm7438_vm1 = vmmov 0  }
  0x36   :  { %122 = vadd.xlane.f32.xlu0 %v121_v2  ;;  %v168_v16 = vld [vmem:[#allocation7 + $0xa0] sm:$0xff]  ;;  %6738 = vmatprep.subr.mxu1 %v169_v14  ;;  %v346_v17 = vld [vmem:[#allocation7 + $0xb0] sm:$0xff]  ;;  %v260_v39 = vld [vmem:[#allocation7 + $0xa8] sm:$0xff]  ;;  %v7499_v44 = vand.u32 127, %v75_v43  ;;  %v118_v45 = vshrl.u32 %v75_v43, 7  ;;  %s7439_s2 = smov [#allocation10]  }
  0x37   :  { %6760 = vmatprep.subr.mxu0 %v347_v15  ;;  %6739 = vmatpush3.msra.mxu1 %v169_v14  ;;  %v167_v18 = vld [vmem:[#allocation7 + $0x50] sm:$0xff]  ;;  %v345_v19 = vld [vmem:[#allocation7 + $0x60] sm:$0xff]  ;;  %v259_v40 = vld [vmem:[#allocation7 + $0x58] sm:$0xff]  ;;  %s6400_s3 = sshll.u32 %s7439_s2, 4  ;;  %s6401_s3 = int_to_ptr.vmem [resolvable:$true] %s6400_s3 }
  0x38   :  { %6761 = vmatpush3.msra.mxu0 %v347_v15  ;;  %6740 = vmatprep.subr.mxu1 %v168_v16  ;;  %v166_v20 = vld [vmem:[#allocation7] sm:$0xff]  ;;  %v344_v21 = vld [vmem:[#allocation7 + $0x10] sm:$0xff]  ;;  %v258_v41 = vld [vmem:[#allocation7 + $0x8] sm:$0xff]  ;;  %vm7502_vm2 = vcmp.le.s32.totalorder %v7499_v44, %v118_v45  ;;  %vm79_vm3 = vcmp.ge.s32.totalorder %v7499_v44, 8  ;;  %vm87_vm4 = vcmp.lt.s32.totalorder %v7499_v44, 12  ;;  %vm85_vm5 = vcmp.lt.s32.totalorder %v7499_v44, 4  ;;  %p7406_p7 = scmp.lt.s32.totalorder %s6401_s3, %s6401_s3 }
  0x39   :  { %6762 = vmatprep.subr.mxu0 %v346_v17  ;;  %6741 = vmatpush3.msra.mxu1 %v168_v16  ;;  %v6422_v30 = vld [vmem:[#allocation8] ss:$0 sm:$0xff]  ;;  %v6423_v32 = vld [vmem:[#allocation8 + $0x1] ss:$0 sm:$0xff]  ;;  %v7506_v47 = vld [vmem:[#allocation8 + $0x6] ss:$0 sm:$0xff] }
  0x3a   :  { %125 = vadd.xlane.f32.xlu0 %v124_v3  ;;  %6763 = vmatpush3.msra.mxu0 %v346_v17  ;;  %vm95_vm6 = vmand %vm79_vm3, %vm87_vm4  ;;  %vm78_vm7 = vcmp.ge.s32.totalorder %v7499_v44, 4  ;;  %vm86_vm8 = vcmp.lt.s32.totalorder %v7499_v44, 8  ;;  %v6427_v53 = vld [vmem:[#allocation8 + $0x5] ss:$0 sm:$0xff]  ;;  %vm81_vm9 = vcmp.ge.s32.totalorder %v7499_v44, 16  ;;  %vm89_vm10 = vcmp.lt.s32.totalorder %v7499_v44, 20 }
  0x3b   :  { %6742 = vmatprep.subr.mxu1 %v167_v18  ;;  %6764 = vmatprep.subr.mxu0 %v345_v19  ;;  %v6424_v55 = vld [vmem:[#allocation8 + $0x4] ss:$0 sm:$0xff]  ;;  %v7523_v58 = vsel %vm85_vm5, 1.0, %v7437_v42  ;;  %v7526_v59 = vsel %vm95_vm6, 1.0, %v7437_v42  ;;  %vm94_vm11 = vmand %vm78_vm7, %vm86_vm8  ;;  %vm80_vm13 = vcmp.ge.s32.totalorder %v7499_v44, 12  ;;  %vm88_vm14 = vcmp.lt.s32.totalorder %v7499_v44, 16 }
  0x3c   :  { %6743 = vmatpush3.msra.mxu1 %v167_v18  ;;  %6765 = vmatpush3.msra.mxu0 %v345_v19  ;;  %vm97_vm12 = vmand %vm81_vm9, %vm89_vm10  ;;  %vm83_vm15 = vcmp.ge.s32.totalorder %v7499_v44, 24  ;;  %vm91_vm3 = vcmp.lt.s32.totalorder %v7499_v44, 28  ;;  %vm82_vm6 = vcmp.ge.s32.totalorder %v7499_v44, 20  ;;  %vm90_vm7 = vcmp.lt.s32.totalorder %v7499_v44, 24  ;;  %s7401_s11 = scalar_lea.vmem %s6401_s3, 256 }
  0x3d   :  { %6744 = vmatprep.subr.mxu1 %v166_v20  ;;  %6766 = vmatprep.subr.mxu0 %v344_v21  ;;  %vm96_vm4 = vmand %vm80_vm13, %vm88_vm14  ;;  %vm84_vm9 = vcmp.ge.s32.totalorder %v7499_v44, 28  ;;  %vm92_vm10 = vcmp.lt.s32.totalorder %v7499_v44, 32  ;;  %p7402_p6 = scmp.ne.s32.totalorder %s6401_s3, %s7401_s11  ;;  %p7407_p8 = scmp.lt.s32.totalorder %s7401_s11, %s7401_s11 }
  0x3e   :  { %6745 = vmatpush3.msra.mxu1 %v166_v20  ;;  %6767 = vmatpush3.msra.mxu0 %v344_v21  ;;  %vm99_vm5 = vmand %vm83_vm15, %vm91_vm3 }
  0x3f   :  { %6749 = vmatprep.subr.mxu1 %v261_v22  ;;  %6781 = vmatprep.subr.mxu0 %v7437_v42  ;;  %vm98_vm8 = vmand %vm82_vm6, %vm90_vm7  ;;  %p7408_p9 = por %p7407_p8, %p7406_p7 }
  0x40   :  { %v7601_v14 = vsel %vm98_vm8, 1.0, %v7437_v42 }
  0x41   :  { %p7409_p10 = pnand %p7408_p9, %p7402_p6 }
  0xbf   :  { %v123_v4 = vpop.xlane.xlu0 %122 }
  0xc0   :  { %v128_v5 = vmul.f32 0.03125, %v123_v4 }
  0xc2   :  { %v130_v6 = vsub.f32 %v71_v0, %v128_v5  ;;  %v7545_v0 = vsel %vm94_vm11, 1.0, %v7437_v42  ;;  %vm100_vm11 = vmand %vm84_vm9, %vm92_vm10 }
  0xc3   :  { %v126_v7 = vpop.xlane.xlu0 %125  ;;  %v7622_v19 = vsel %vm100_vm11, 1.0, %v7437_v42 }
  0xc4   :  { %v129_v8 = vmul.f32 0.03125, %v126_v7  ;;  %v132_v9 = vmul.f32 %v130_v6, %v130_v6  ;;  %v7572_v7 = vsel %vm99_vm5, 1.0, %v7437_v42 }
  0xc6   :  { %v131_v10 = vsub.f32 %v72_v1, %v129_v8  ;;  %v134_v11 = vsel %vm120_vm0, %v132_v9, 0.0  ;;  %v7548_v1 = vsel %vm97_vm12, 1.0, %v7437_v42  ;;  %vm1712_vm12 = vcmask 64512  }
  0xc7   :  { %135 = vadd.xlane.f32.xlu1 %v134_v11 }
  0xc8   :  { %v133_v12 = vmul.f32 %v131_v10, %v131_v10 }
  0xca   :  { %v137_v13 = vsel %vm120_vm0, %v133_v12, 0.0 }
  0xcb   :  { %138 = vadd.xlane.f32.xlu1 %v137_v13 }
 0x150   :  { %v136_v23 = vpop.xlane.xlu1 %135 }
 0x151   :  { %v140_v24 = vmul.f32 0.03125, %v136_v23 }
 0x153   :  { %v142_v25 = vadd.f32 1e-05, %v140_v24 }
 0x154   :  { %v139_v26 = vpop.xlane.xlu1 %138 }
 0x155   :  { %7179 = vrsqrt.f32 %v142_v25  ;;  %v141_v27 = vmul.f32 0.03125, %v139_v26 }
 0x157   :  { %v143_v28 = vadd.f32 1e-05, %v141_v27 }
 0x159   :  { %7181 = vrsqrt.f32 %v143_v28 }
 0x162   :  { %v7180_v29 = vpop.eup %7179 }
 0x163   :  { %v146_v31 = vmul.f32 %v7180_v29, %v130_v6  ;;  %v7569_v6 = vsel %vm96_vm4, 1.0, %v7437_v42 }
 0x165   :  { %v155_v33 = vmul.f32 %v6422_v30, %v146_v31 }
 0x166   :  { %v7182_v34 = vpop.eup %7181 }
 0x167   :  { %v147_v35 = vmul.f32 %v7182_v34, %v131_v10  ;;  %v164_v36 = vadd.f32 %v6423_v32, %v155_v33 }
 0x169   :  { %v156_v37 = vmul.f32 %v6422_v30, %v147_v35  ;;  %6746 = vmatprep.mubr.msk.f32.mxu1 %vm120_vm0, %v164_v36  ;;  %6768 = vmatprep.mubr.msk.f32.mxu0 %vm120_vm0, %v164_v36 }
 0x16b   :  { %v165_v38 = vadd.f32 %v6423_v32, %v156_v37 }
 0x16d   :  { %6747 = vmatmul.mubr.msk.f32.vlgmr.msra.gmra.mxu1 %vm120_vm0, %v165_v38  ;;  %6769 = vmatmul.mubr.msk.f32.vlgmr.msra.gmra.mxu0 %vm120_vm0, %v165_v38 }
 0x16e   :  { %6750 = vmatpush3.msra.mxu1 %v261_v22  ;;  %6757 = vmatprep.mubr.msk.f32.mxu1 %vm120_vm0, %v164_v36 }
 0x16f   :  { %6751 = vmatprep.subr.mxu1 %v260_v39  ;;  %6783 = vmatprep.mubr.msk.f32.mxu0 %vm7438_vm1, %v7437_v42 }
 0x170   :  { %6752 = vmatpush3.msra.mxu1 %v260_v39 }
 0x171   :  { %6753 = vmatprep.subr.mxu1 %v259_v40 }
 0x172   :  { %6754 = vmatpush3.msra.mxu1 %v259_v40 }
 0x173   :  { %6755 = vmatprep.subr.mxu1 %v258_v41 }
 0x174   :  { %6756 = vmatpush3.msra.mxu1 %v258_v41 }
 0x175   :  { %6758 = vmatmul.mubr.msk.f32.vlgmr.msra.gmra.mxu1 %vm120_vm0, %v165_v38  ;;  %6771 = vmatprep.subr.mxu1 %v7437_v42 }
 0x176   :  { %6773 = vmatprep.mubr.msk.f32.mxu1 %vm7438_vm1, %v7437_v42 }
 0x22d   :  { %v6770_v48 = vpop.f32.mrf.mxu0  ;;  %v6748_v50 = vpop.f32.mrf.mxu1 }
 0x22e   :  { %v7509_v49 = vadd.f32 %v6770_v48, %v7506_v47  ;;  %v7590_v11 = vadd.f32 %v6748_v50, %v6424_v55 }
 0x22f   :  { %v249_v51 = vpop.f32.mrf.mxu1  ;;  %v421_v26 = vpop.f32.mrf.mxu0 }
 0x230   :  { %v7520_v57 = vadd.f32 %v6424_v55, %v249_v51  ;;  %v438_v18 = vmul.f32 %v7523_v58, %v7590_v11  ;;  %v440_v23 = vmul.f32 %v7526_v59, %v7590_v11  ;;  %v439_v27 = vmul.f32 %v7545_v0, %v7590_v11 }
 0x231   :  { %v442_v28 = vmul.f32 %v7548_v1, %v7590_v11  ;;  %v7661_v29 = vadd.f32 %v7506_v47, %v421_v26  ;;  %v441_v32 = vmul.f32 %v7569_v6, %v7590_v11  ;;  %v444_v33 = vmul.f32 %v7572_v7, %v7590_v11 }
 0x232   :  { %v430_v62 = vmul.f32 %v7523_v58, %v7520_v57  ;;  %v432_v63 = vmul.f32 %v7526_v59, %v7520_v57  ;;  %v431_v4 = vmul.f32 %v7545_v0, %v7520_v57  ;;  %v434_v5 = vmul.f32 %v7548_v1, %v7520_v57 }
 0x233   :  { %v433_v12 = vmul.f32 %v7569_v6, %v7520_v57  ;;  %v436_v13 = vmul.f32 %v7572_v7, %v7520_v57  ;;  %v435_v17 = vmul.f32 %v7601_v14, %v7520_v57  ;;  %v437_v22 = vmul.f32 %v7622_v19, %v7520_v57 }
 0x234   :  { %v462_v35 = vmul.f32 %v7523_v58, %v7661_v29  ;;  %v443_v36 = vmul.f32 %v7601_v14, %v7590_v11  ;;  %v445_v38 = vmul.f32 %v7622_v19, %v7590_v11  ;;  %v463_v39 = vmul.f32 %v7545_v0, %v7661_v29 }
 0x235   :  { %v6759_v52 = vpop.f32.mrf.mxu1 }
 0x236   :  { %v7574_v8 = vadd.f32 %v6759_v52, %v6427_v53 }
 0x237   :  { %v335_v54 = vpop.f32.mrf.mxu1 }
 0x238   :  { %v7518_v56 = vadd.f32 %v6427_v53, %v335_v54  ;;  %v454_v16 = vmul.f32 %v7523_v58, %v7574_v8  ;;  %v456_v21 = vmul.f32 %v7526_v59, %v7574_v8  ;;  %v455_v24 = vmul.f32 %v7545_v0, %v7574_v8 }
 0x239   :  { %v458_v25 = vmul.f32 %v7548_v1, %v7574_v8  ;;  %v457_v30 = vmul.f32 %v7569_v6, %v7574_v8  ;;  %v460_v31 = vmul.f32 %v7572_v7, %v7574_v8  ;;  %v459_v34 = vmul.f32 %v7601_v14, %v7574_v8 }
 0x23a   :  { %v446_v60 = vmul.f32 %v7523_v58, %v7518_v56  ;;  %v448_v61 = vmul.f32 %v7526_v59, %v7518_v56  ;;  %v447_v2 = vmul.f32 %v7545_v0, %v7518_v56  ;;  %v450_v3 = vmul.f32 %v7548_v1, %v7518_v56 }
 0x23b   :  { %v449_v9 = vmul.f32 %v7569_v6, %v7518_v56  ;;  %v452_v10 = vmul.f32 %v7572_v7, %v7518_v56  ;;  %v451_v15 = vmul.f32 %v7601_v14, %v7518_v56  ;;  %v453_v20 = vmul.f32 %v7622_v19, %v7518_v56 }
 0x23c   :  { %6772 = vmatpush3.xpose.msk.msra.mxu1 %vm120_vm0, %v446_v60  ;;  %6782 = vmatpush3.xpose.msk.msra.mxu0 %vm120_vm0, %v448_v61  ;;  %v461_v37 = vmul.f32 %v7622_v19, %v7574_v8 }
 0x23d   :  { %6776 = vmatprep.subr.mxu1 %v7437_v42  ;;  %6791 = vmatprep.subr.mxu0 %v7437_v42 }
 0x23f   :  { %6774 = vmatmul.mubr.msk.f32.vlgmr.msra.gmra.mxu1 %vm120_vm0, %v430_v62  ;;  %6784 = vmatmul.mubr.msk.f32.vlgmr.msra.gmra.mxu0 %vm120_vm0, %v432_v63 }
 0x240   :  { %6777 = vmatpush3.xpose.msk.msra.mxu1 %vm120_vm0, %v447_v2  ;;  %6792 = vmatpush3.xpose.msk.msra.mxu0 %vm120_vm0, %v450_v3 }
 0x241   :  { %6778 = vmatprep.mubr.msk.f32.mxu1 %vm7438_vm1, %v7437_v42  ;;  %6793 = vmatprep.mubr.msk.f32.mxu0 %vm7438_vm1, %v7437_v42 }
 0x242   :  { %6786 = vmatprep.subr.mxu1 %v7437_v42  ;;  %6801 = vmatprep.subr.mxu0 %v7437_v42 }
 0x243   :  { %6779 = vmatmul.mubr.msk.f32.vlgmr.msra.gmra.mxu1 %vm120_vm0, %v431_v4  ;;  %6794 = vmatmul.mubr.msk.f32.vlgmr.msra.gmra.mxu0 %vm120_vm0, %v434_v5 }
 0x244   :  { %6787 = vmatpush3.xpose.msk.msra.mxu1 %vm120_vm0, %v449_v9  ;;  %6802 = vmatpush3.xpose.msk.msra.mxu0 %vm120_vm0, %v452_v10 }
 0x245   :  { %6788 = vmatprep.mubr.msk.f32.mxu1 %vm7438_vm1, %v7437_v42  ;;  %6803 = vmatprep.mubr.msk.f32.mxu0 %vm7438_vm1, %v7437_v42 }
 0x246   :  { %6796 = vmatprep.subr.mxu1 %v7437_v42  ;;  %6811 = vmatprep.subr.mxu0 %v7437_v42 }
 0x247   :  { %6789 = vmatmul.mubr.msk.f32.vlgmr.msra.gmra.mxu1 %vm120_vm0, %v433_v12  ;;  %6804 = vmatmul.mubr.msk.f32.vlgmr.msra.gmra.mxu0 %vm120_vm0, %v436_v13 }
 0x248   :  { %6797 = vmatpush3.xpose.msk.msra.mxu1 %vm120_vm0, %v451_v15  ;;  %6812 = vmatpush3.xpose.msk.msra.mxu0 %vm120_vm0, %v454_v16 }
 0x249   :  { %6798 = vmatprep.mubr.msk.f32.mxu1 %vm7438_vm1, %v7437_v42  ;;  %6813 = vmatprep.mubr.msk.f32.mxu0 %vm7438_vm1, %v7437_v42 }
 0x24a   :  { %6806 = vmatprep.subr.mxu1 %v7437_v42  ;;  %6821 = vmatprep.subr.mxu0 %v7437_v42 }
 0x24b   :  { %6799 = vmatmul.mubr.msk.f32.vlgmr.msra.gmra.mxu1 %vm120_vm0, %v435_v17  ;;  %6814 = vmatmul.mubr.msk.f32.vlgmr.msra.gmra.mxu0 %vm120_vm0, %v438_v18 }
 0x24c   :  { %6807 = vmatpush3.xpose.msk.msra.mxu1 %vm120_vm0, %v453_v20  ;;  %6822 = vmatpush3.xpose.msk.msra.mxu0 %vm120_vm0, %v456_v21 }
 0x24d   :  { %6808 = vmatprep.mubr.msk.f32.mxu1 %vm7438_vm1, %v7437_v42  ;;  %6823 = vmatprep.mubr.msk.f32.mxu0 %vm7438_vm1, %v7437_v42 }
 0x24e   :  { %6816 = vmatprep.subr.mxu1 %v7437_v42  ;;  %6831 = vmatprep.subr.mxu0 %v7437_v42 }
 0x24f   :  { %6809 = vmatmul.mubr.msk.f32.vlgmr.msra.gmra.mxu1 %vm120_vm0, %v437_v22  ;;  %6824 = vmatmul.mubr.msk.f32.vlgmr.msra.gmra.mxu0 %vm120_vm0, %v440_v23 }
 0x250   :  { %6817 = vmatpush3.xpose.msk.msra.mxu1 %vm120_vm0, %v455_v24  ;;  %6832 = vmatpush3.xpose.msk.msra.mxu0 %vm120_vm0, %v458_v25 }
 0x251   :  { %6818 = vmatprep.mubr.msk.f32.mxu1 %vm7438_vm1, %v7437_v42  ;;  %6833 = vmatprep.mubr.msk.f32.mxu0 %vm7438_vm1, %v7437_v42 }
 0x252   :  { %6826 = vmatprep.subr.mxu1 %v7437_v42  ;;  %6841 = vmatprep.subr.mxu0 %v7437_v42 }
 0x253   :  { %6819 = vmatmul.mubr.msk.f32.vlgmr.msra.gmra.mxu1 %vm120_vm0, %v439_v27  ;;  %6834 = vmatmul.mubr.msk.f32.vlgmr.msra.gmra.mxu0 %vm120_vm0, %v442_v28 }
 0x254   :  { %6827 = vmatpush3.xpose.msk.msra.mxu1 %vm120_vm0, %v457_v30  ;;  %6842 = vmatpush3.xpose.msk.msra.mxu0 %vm120_vm0, %v460_v31 }
 0x255   :  { %6828 = vmatprep.mubr.msk.f32.mxu1 %vm7438_vm1, %v7437_v42  ;;  %6843 = vmatprep.mubr.msk.f32.mxu0 %vm7438_vm1, %v7437_v42 }
 0x256   :  { %6836 = vmatprep.subr.mxu1 %v7437_v42  ;;  %6851 = vmatprep.subr.mxu0 %v7437_v42 }
 0x257   :  { %6829 = vmatmul.mubr.msk.f32.vlgmr.msra.gmra.mxu1 %vm120_vm0, %v441_v32  ;;  %6844 = vmatmul.mubr.msk.f32.vlgmr.msra.gmra.mxu0 %vm120_vm0, %v444_v33 }
 0x258   :  { %6837 = vmatpush3.xpose.msk.msra.mxu1 %vm120_vm0, %v459_v34  ;;  %6852 = vmatpush3.msra.mxu0 %v462_v35 }
 0x259   :  { %6838 = vmatprep.mubr.msk.f32.mxu1 %vm7438_vm1, %v7437_v42  ;;  %6846 = vmatprep.subr.mxu1 %v7437_v42 }
 0x25a   :  { %6853 = vmatprep.mubr.msk.f32.mxu0 %vm7438_vm1, %v7437_v42  ;;  %6861 = vmatprep.subr.mxu0 %v7437_v42 }
 0x25b   :  { %6839 = vmatmul.mubr.msk.f32.vlgmr.msra.gmra.mxu1 %vm120_vm0, %v443_v36 }
 0x25c   :  { %6847 = vmatpush3.xpose.msk.msra.mxu1 %vm120_vm0, %v461_v37  ;;  %6848 = vmatprep.mubr.msk.f32.mxu1 %vm7438_vm1, %v7437_v42 }
 0x25d   :  { %6856 = vmatprep.subr.mxu1 %v7437_v42 }
 0x25f   :  { %6849 = vmatmul.mubr.msk.f32.vlgmr.msra.gmra.mxu1 %vm120_vm0, %v445_v38 }
 0x260   :  { %6857 = vmatpush3.msra.mxu1 %v463_v39  ;;  %6858 = vmatprep.mubr.msk.f32.mxu1 %vm7438_vm1, %v7437_v42 }
 0x261   :  { %6866 = vmatprep.subr.mxu1 %v7437_v42 }
 0x2ff   :  { %v550_v40 = vpop.f32.mrf.mxu1  ;;  %v702_v41 = vpop.f32.mrf.mxu0 }
 0x300   :  { %v7715_v43 = vsel %vm7502_vm2, %v550_v40, -1e+30  ;;  %v7721_v48 = vsel %vm7502_vm2, %v702_v41, -1e+30 }
 0x301   :  { %v6775_v44 = vpop.f32.mrf.mxu1  ;;  %v6785_v45 = vpop.f32.mrf.mxu0  ;;  %v1713_v47 = vsel %vm1712_vm12, %v7715_v43, -inf  ;;  %v1719_v55 = vsel %vm1712_vm12, %v7721_v48, -inf }
 0x302   :  { %1714 = vmax.xlane.f32.xlu0 %v1713_v47 }
 0x303   :  { %v626_v50 = vpop.f32.mrf.mxu1  ;;  %v854_v51 = vpop.f32.mrf.mxu0 }
 0x304   :  { %v7725_v52 = vsel %vm7502_vm2, %v626_v50, -1e+30  ;;  %v7733_v57 = vsel %vm7502_vm2, %v854_v51, -1e+30 }
 0x305   :  { %v6780_v53 = vpop.f32.mrf.mxu1  ;;  %v6795_v54 = vpop.f32.mrf.mxu0  ;;  %v1716_v56 = vsel %vm1712_vm12, %v7725_v52, -inf  ;;  %v1725_v3 = vsel %vm1712_vm12, %v7733_v57, -inf }
 0x306   :  { %1720 = vmax.xlane.f32.xlu0 %v1719_v55  ;;  %1717 = vmax.xlane.f32.xlu1 %v1716_v56 }
 0x307   :  { %v778_v60 = vpop.f32.mrf.mxu1  ;;  %v1006_v61 = vpop.f32.mrf.mxu0 }
 0x308   :  { %v7737_v62 = vsel %vm7502_vm2, %v778_v60, -1e+30  ;;  %v7745_v5 = vsel %vm7502_vm2, %v1006_v61, -1e+30 }
 0x309   :  { %v6790_v63 = vpop.f32.mrf.mxu1  ;;  %v6805_v2 = vpop.f32.mrf.mxu0  ;;  %v1722_v4 = vsel %vm1712_vm12, %v7737_v62, -inf  ;;  %v1731_v13 = vsel %vm1712_vm12, %v7745_v5, -inf }
 0x30a   :  { %1726 = vmax.xlane.f32.xlu0 %v1725_v3  ;;  %1723 = vmax.xlane.f32.xlu1 %v1722_v4 }
 0x30b   :  { %v930_v8 = vpop.f32.mrf.mxu1  ;;  %v1158_v9 = vpop.f32.mrf.mxu0 }
 0x30c   :  { %v7749_v10 = vsel %vm7502_vm2, %v930_v8, -1e+30  ;;  %v7757_v16 = vsel %vm7502_vm2, %v1158_v9, -1e+30 }
 0x30d   :  { %v6800_v11 = vpop.f32.mrf.mxu1  ;;  %v6815_v12 = vpop.f32.mrf.mxu0  ;;  %v1728_v15 = vsel %vm1712_vm12, %v7749_v10, -inf  ;;  %v1737_v23 = vsel %vm1712_vm12, %v7757_v16, -inf }
 0x30e   :  { %1732 = vmax.xlane.f32.xlu0 %v1731_v13  ;;  %1729 = vmax.xlane.f32.xlu1 %v1728_v15 }
 0x30f   :  { %v1082_v17 = vpop.f32.mrf.mxu1  ;;  %v1310_v18 = vpop.f32.mrf.mxu0 }
 0x310   :  { %v7761_v20 = vsel %vm7502_vm2, %v1082_v17, -1e+30  ;;  %v7769_v25 = vsel %vm7502_vm2, %v1310_v18, -1e+30 }
 0x311   :  { %v6810_v21 = vpop.f32.mrf.mxu1  ;;  %v6825_v22 = vpop.f32.mrf.mxu0  ;;  %v1734_v24 = vsel %vm1712_vm12, %v7761_v20, -inf  ;;  %v1743_v32 = vsel %vm1712_vm12, %v7769_v25, -inf }
 0x312   :  { %1738 = vmax.xlane.f32.xlu0 %v1737_v23  ;;  %1735 = vmax.xlane.f32.xlu1 %v1734_v24 }
 0x313   :  { %v1234_v26 = vpop.f32.mrf.mxu1  ;;  %v1462_v27 = vpop.f32.mrf.mxu0 }
 0x314   :  { %v7773_v28 = vsel %vm7502_vm2, %v1234_v26, -1e+30  ;;  %v7781_v34 = vsel %vm7502_vm2, %v1462_v27, -1e+30 }
 0x315   :  { %v6820_v30 = vpop.f32.mrf.mxu1  ;;  %v6835_v31 = vpop.f32.mrf.mxu0  ;;  %v1740_v33 = vsel %vm1712_vm12, %v7773_v28, -inf  ;;  %v1749_v40 = vsel %vm1712_vm12, %v7781_v34, -inf }
 0x316   :  { %1744 = vmax.xlane.f32.xlu0 %v1743_v32  ;;  %1741 = vmax.xlane.f32.xlu1 %v1740_v33 }
 0x317   :  { %v1386_v35 = vpop.f32.mrf.mxu1  ;;  %v1614_v36 = vpop.f32.mrf.mxu0 }
 0x318   :  { %v7785_v37 = vsel %vm7502_vm2, %v1386_v35, -1e+30  ;;  %v7793_v44 = vsel %vm7502_vm2, %v1614_v36, -1e+30 }
 0x319   :  { %v6830_v38 = vpop.f32.mrf.mxu1  ;;  %v6845_v39 = vpop.f32.mrf.mxu0  ;;  %v1746_v41 = vsel %vm1712_vm12, %v7785_v37, -inf  ;;  %v1755_v51 = vsel %vm1712_vm12, %v7793_v44, -inf }
 0x31a   :  { %1750 = vmax.xlane.f32.xlu0 %v1749_v40  ;;  %1747 = vmax.xlane.f32.xlu1 %v1746_v41 }
 0x31b   :  { %v1538_v45 = vpop.f32.mrf.mxu1 }
 0x31c   :  { %v7797_v47 = vsel %vm7502_vm2, %v1538_v45, -1e+30 }
 0x31d   :  { %v6840_v50 = vpop.f32.mrf.mxu1  ;;  %v1752_v53 = vsel %vm1712_vm12, %v7797_v47, -inf }
 0x31e   :  { %1756 = vmax.xlane.f32.xlu0 %v1755_v51  ;;  %1753 = vmax.xlane.f32.xlu1 %v1752_v53 }
 0x31f   :  { %v1690_v54 = vpop.f32.mrf.mxu1 }
 0x320   :  { %v7805_v55 = vsel %vm7502_vm2, %v1690_v54, -1e+30 }
 0x321   :  { %v6850_v56 = vpop.f32.mrf.mxu1  ;;  %v1758_v60 = vsel %vm1712_vm12, %v7805_v55, -inf }
 0x322   :  { %1759 = vmax.xlane.f32.xlu1 %v1758_v60 }
 0x38b   :  { %v1715_v61 = vpop.xlane.xlu0 %1714 }
 0x38c   :  { %v1761_v63 = vsub.f32 %v7715_v43, %v1715_v61 }
 0x38e   :  { %v1777_v2 = vmul.f32 1.442695, %v1761_v63 }
 0x38f   :  { %v1721_v3 = vpop.xlane.xlu0 %1720  ;;  %v1718_v4 = vpop.xlane.xlu1 %1717 }
 0x390   :  { %7183 = vpow2.f32 %v1777_v2  ;;  %v1763_v8 = vsub.f32 %v7721_v48, %v1721_v3  ;;  %v1762_v9 = vsub.f32 %v7725_v52, %v1718_v4 }
 0x392   :  { %v1781_v11 = vmul.f32 1.442695, %v1763_v8  ;;  %v1779_v46 = vmul.f32 1.442695, %v1762_v9 }
 0x393   :  { %v1727_v12 = vpop.xlane.xlu0 %1726  ;;  %v1724_v13 = vpop.xlane.xlu1 %1723 }
 0x394   :  { %7185 = vpow2.f32 %v1781_v11  ;;  %v1765_v15 = vsub.f32 %v7733_v57, %v1727_v12  ;;  %v1764_v17 = vsub.f32 %v7737_v62, %v1724_v13 }
 0x395   :  { %7187 = vpow2.f32 %v1779_v46 }
 0x396   :  { %v1785_v18 = vmul.f32 1.442695, %v1765_v15  ;;  %v1783_v43 = vmul.f32 1.442695, %v1764_v17 }
 0x397   :  { %v1733_v21 = vpop.xlane.xlu0 %1732  ;;  %v1730_v22 = vpop.xlane.xlu1 %1729 }
 0x398   :  { %7189 = vpow2.f32 %v1785_v18  ;;  %v1767_v23 = vsub.f32 %v7745_v5, %v1733_v21  ;;  %v1766_v48 = vsub.f32 %v7749_v10, %v1730_v22 }
 0x399   :  { %7191 = vpow2.f32 %v1783_v43 }
 0x39a   :  { %v1789_v52 = vmul.f32 1.442695, %v1767_v23  ;;  %v1787_v24 = vmul.f32 1.442695, %v1766_v48 }
 0x39b   :  { %v1739_v26 = vpop.xlane.xlu0 %1738  ;;  %v1736_v27 = vpop.xlane.xlu1 %1735 }
 0x39c   :  { %7193 = vpow2.f32 %v1789_v52  ;;  %v1769_v57 = vsub.f32 %v7757_v16, %v1739_v26  ;;  %v1768_v62 = vsub.f32 %v7761_v20, %v1736_v27 }
 0x39d   :  { %v7818_v30 = vpop.eup %7183  ;;  %7195 = vpow2.f32 %v1787_v24 }
 0x39e   :  { %v1793_v31 = vmul.f32 1.442695, %v1769_v57  ;;  %v1791_v32 = vmul.f32 1.442695, %v1768_v62  ;;  %v1809_v5 = vsel %vm1712_vm12, %v7818_v30, 0.0 }
 0x39f   :  { %1810 = vadd.xlane.f32.xlu0 %v1809_v5  ;;  %v1745_v10 = vpop.xlane.xlu0 %1744  ;;  %v1742_v33 = vpop.xlane.xlu1 %1741 }
 0x3a0   :  { %7197 = vpow2.f32 %v1793_v31  ;;  %v1771_v35 = vsub.f32 %v7769_v25, %v1745_v10  ;;  %v1770_v36 = vsub.f32 %v7773_v28, %v1742_v33 }
 0x3a1   :  { %v7824_v38 = vpop.eup %7185  ;;  %7199 = vpow2.f32 %v1791_v32 }
 0x3a2   :  { %v7826_v16 = vpop.eup %7187  ;;  %v1797_v20 = vmul.f32 1.442695, %v1771_v35  ;;  %v1795_v39 = vmul.f32 1.442695, %v1770_v36  ;;  %v1815_v40 = vsel %vm1712_vm12, %v7824_v38, 0.0 }
 0x3a3   :  { %1816 = vadd.xlane.f32.xlu0 %v1815_v40  ;;  %v1751_v41 = vpop.xlane.xlu0 %1750  ;;  %v1748_v45 = vpop.xlane.xlu1 %1747  ;;  %v1812_v50 = vsel %vm1712_vm12, %v7826_v16, 0.0 }
 0x3a4   :  { %7201 = vpow2.f32 %v1797_v20  ;;  %v1773_v25 = vsub.f32 %v7781_v34, %v1751_v41  ;;  %v1772_v28 = vsub.f32 %v7785_v37, %v1748_v45  ;;  %1813 = vadd.xlane.f32.xlu1 %v1812_v50  ;;  %v464_v50 = vmul.f32 %v7526_v59, %v7661_v29 }
 0x3a5   :  { %v7834_v51 = vpop.eup %7189  ;;  %7203 = vpow2.f32 %v1795_v39 }
 0x3a6   :  { %v7836_v53 = vpop.eup %7191  ;;  %v1801_v54 = vmul.f32 1.442695, %v1773_v25  ;;  %v1799_v56 = vmul.f32 1.442695, %v1772_v28  ;;  %v1821_v60 = vsel %vm1712_vm12, %v7834_v51, 0.0 }
 0x3a7   :  { %1822 = vadd.xlane.f32.xlu0 %v1821_v60  ;;  %v1757_v61 = vpop.xlane.xlu0 %1756  ;;  %v1754_v63 = vpop.xlane.xlu1 %1753  ;;  %v1818_v2 = vsel %vm1712_vm12, %v7836_v53, 0.0 }
 0x3a8   :  { %7205 = vpow2.f32 %v1801_v54  ;;  %v1775_v34 = vsub.f32 %v7793_v44, %v1757_v61  ;;  %v1774_v37 = vsub.f32 %v7797_v47, %v1754_v63  ;;  %1819 = vadd.xlane.f32.xlu1 %v1818_v2  ;;  %v466_v61 = vmul.f32 %v7548_v1, %v7661_v29 }
 0x3a9   :  { %v7844_v3 = vpop.eup %7193  ;;  %7207 = vpow2.f32 %v1799_v56  ;;  %v465_v2 = vmul.f32 %v7569_v6, %v7661_v29 }
 0x3aa   :  { %v7846_v4 = vpop.eup %7195  ;;  %v1805_v8 = vmul.f32 1.442695, %v1775_v34  ;;  %v1803_v9 = vmul.f32 1.442695, %v1774_v37  ;;  %v1827_v11 = vsel %vm1712_vm12, %v7844_v3, 0.0 }
 0x3ab   :  { %1828 = vadd.xlane.f32.xlu0 %v1827_v11  ;;  %v1824_v46 = vsel %vm1712_vm12, %v7846_v4, 0.0  ;;  %v1760_v12 = vpop.xlane.xlu1 %1759 }
 0x3ac   :  { %7209 = vpow2.f32 %v1805_v8  ;;  %1825 = vadd.xlane.f32.xlu1 %v1824_v46  ;;  %v1776_v44 = vsub.f32 %v7805_v55, %v1760_v12 }
 0x3ad   :  { %v7853_v47 = vpop.eup %7197  ;;  %7211 = vpow2.f32 %v1803_v9  ;;  %v468_v9 = vmul.f32 %v7572_v7, %v7661_v29 }
 0x3ae   :  { %v7855_v13 = vpop.eup %7199  ;;  %v1807_v15 = vmul.f32 1.442695, %v1776_v44  ;;  %v1833_v17 = vsel %vm1712_vm12, %v7853_v47, 0.0 }
 0x3af   :  { %1834 = vadd.xlane.f32.xlu0 %v1833_v17  ;;  %v1830_v18 = vsel %vm1712_vm12, %v7855_v13, 0.0  ;;  %v470_v17 = vmul.f32 %v7523_v58, %v7509_v49 }
 0x3b0   :  { %7213 = vpow2.f32 %v1807_v15  ;;  %1831 = vadd.xlane.f32.xlu1 %v1830_v18 }
 0x3b1   :  { %v7861_v43 = vpop.eup %7201 }
 0x3b2   :  { %v7863_v21 = vpop.eup %7203  ;;  %v1839_v55 = vsel %vm1712_vm12, %v7861_v43, 0.0 }
 0x3b3   :  { %1840 = vadd.xlane.f32.xlu0 %v1839_v55  ;;  %v1836_v22 = vsel %vm1712_vm12, %v7863_v21, 0.0 }
 0x3b4   :  { %1837 = vadd.xlane.f32.xlu1 %v1836_v22 }
 0x3b5   :  { %v7869_v23 = vpop.eup %7205 }
 0x3b6   :  { %v7871_v48 = vpop.eup %7207  ;;  %v1845_v52 = vsel %vm1712_vm12, %v7869_v23, 0.0 }
 0x3b7   :  { %1846 = vadd.xlane.f32.xlu0 %v1845_v52  ;;  %v1842_v24 = vsel %vm1712_vm12, %v7871_v48, 0.0 }
 0x3b8   :  { %1843 = vadd.xlane.f32.xlu1 %v1842_v24 }
 0x3b9   :  { %v7877_v26 = vpop.eup %7209 }
 0x3ba   :  { %v7879_v27 = vpop.eup %7211  ;;  %v1851_v57 = vsel %vm1712_vm12, %v7877_v26, 0.0 }
 0x3bb   :  { %1852 = vadd.xlane.f32.xlu0 %v1851_v57  ;;  %v1848_v62 = vsel %vm1712_vm12, %v7879_v27, 0.0  ;;  %v471_v57 = vmul.f32 %v7545_v0, %v7509_v49 }
 0x3bc   :  { %1849 = vadd.xlane.f32.xlu1 %v1848_v62 }
 0x3bd   :  { %v7885_v31 = vpop.eup %7213 }
 0x3be   :  { %v1854_v32 = vsel %vm1712_vm12, %v7885_v31, 0.0 }
 0x3c0   :  { %1855 = vadd.xlane.f32.xlu1 %v1854_v32 }
 0x428   :  { %v1811_v5 = vpop.xlane.xlu0 %1810 }
 0x429   :  { %7215 = vrcp.f32 %v1811_v5  ;;  %v474_v5 = vmul.f32 %v7548_v1, %v7509_v49 }
 0x42c   :  { %v1817_v10 = vpop.xlane.xlu0 %1816 }
 0x42d   :  { %7217 = vrcp.f32 %v1817_v10  ;;  %v1814_v33 = vpop.xlane.xlu1 %1813  ;;  %v473_v10 = vmul.f32 %v7569_v6, %v7509_v49 }
 0x42e   :  { %7219 = vrcp.f32 %v1814_v33 }
 0x430   :  { %v1823_v35 = vpop.xlane.xlu0 %1822 }
 0x431   :  { %7221 = vrcp.f32 %v1823_v35  ;;  %v1820_v36 = vpop.xlane.xlu1 %1819 }
 0x432   :  { %7223 = vrcp.f32 %v1820_v36  ;;  %v476_v36 = vmul.f32 %v7572_v7, %v7509_v49 }
 0x434   :  { %v1829_v20 = vpop.xlane.xlu0 %1828 }
 0x435   :  { %7225 = vrcp.f32 %v1829_v20  ;;  %v1826_v39 = vpop.xlane.xlu1 %1825  ;;  %v475_v20 = vmul.f32 %v7601_v14, %v7509_v49 }
 0x436   :  { %v7216_v40 = vpop.eup %7215  ;;  %7227 = vrcp.f32 %v1826_v39 }
 0x437   :  { %v1873_v41 = vmul.f32 %v7216_v40, %v7818_v30 }
 0x438   :  { %v1835_v45 = vpop.xlane.xlu0 %1834 }
 0x439   :  { %7229 = vrcp.f32 %v1835_v45  ;;  %v1832_v25 = vpop.xlane.xlu1 %1831  ;;  %6854 = vmatmul.mubr.msk.f32.vlgmr.msra.gmra.mxu0 %vm1712_vm12, %v1873_v41  ;;  %v477_v41 = vmul.f32 %v7622_v19, %v7509_v49 }
 0x43a   :  { %v7218_v28 = vpop.eup %7217  ;;  %7231 = vrcp.f32 %v1832_v25  ;;  %6862 = vmatpush3.msra.mxu0 %v464_v50  ;;  %6863 = vmatprep.mubr.msk.f32.mxu0 %vm7438_vm1, %v7437_v42  ;;  %v3074_v50 = vld [vmem:[#allocation7 + $0x108] sm:$0xff] }
 0x43b   :  { %v7220_v54 = vpop.eup %7219  ;;  %6871 = vmatprep.subr.mxu0 %v7437_v42  ;;  %v1875_v56 = vmul.f32 %v7218_v28, %v7824_v38  ;;  %v3072_v25 = vld [vmem:[#allocation7 + $0x68] sm:$0xff]  ;;  %v3071_v28 = vld [vmem:[#allocation7 + $0x18] sm:$0xff] }
 0x43c   :  { %v1841_v30 = vpop.xlane.xlu0 %1840  ;;  %v1874_v60 = vmul.f32 %v7220_v54, %v7826_v16 }
 0x43d   :  { %7233 = vrcp.f32 %v1841_v30  ;;  %v1838_v63 = vpop.xlane.xlu1 %1837  ;;  %6864 = vmatmul.mubr.msk.f32.vlgmr.msra.gmra.mxu0 %vm1712_vm12, %v1875_v56 }
 0x43e   :  { %v7222_v34 = vpop.eup %7221  ;;  %7235 = vrcp.f32 %v1838_v63  ;;  %6859 = vmatmul.mubr.msk.f32.vlgmr.msra.gmra.mxu1 %vm1712_vm12, %v1874_v60  ;;  %6872 = vmatpush3.msra.mxu0 %v466_v61 }
 0x43f   :  { %v7224_v37 = vpop.eup %7223  ;;  %6867 = vmatpush3.msra.mxu1 %v465_v2  ;;  %6873 = vmatprep.mubr.msk.f32.mxu0 %vm7438_vm1, %v7437_v42  ;;  %v1877_v38 = vmul.f32 %v7222_v34, %v7834_v51  ;;  %v467_v51 = vmul.f32 %v7601_v14, %v7661_v29 }
 0x440   :  { %6881 = vmatprep.subr.mxu0 %v7437_v42  ;;  %v1847_v16 = vpop.xlane.xlu0 %1846  ;;  %6868 = vmatprep.mubr.msk.f32.mxu1 %vm7438_vm1, %v7437_v42  ;;  %v1876_v8 = vmul.f32 %v7224_v37, %v7836_v53 }
 0x441   :  { %7237 = vrcp.f32 %v1847_v16  ;;  %6876 = vmatprep.subr.mxu1 %v7437_v42  ;;  %v1844_v11 = vpop.xlane.xlu1 %1843  ;;  %6874 = vmatmul.mubr.msk.f32.vlgmr.msra.gmra.mxu0 %vm1712_vm12, %v1877_v38 }
 0x442   :  { %v7226_v46 = vpop.eup %7225  ;;  %7239 = vrcp.f32 %v1844_v11  ;;  %6869 = vmatmul.mubr.msk.f32.vlgmr.msra.gmra.mxu1 %vm1712_vm12, %v1876_v8  ;;  %6882 = vmatpush3.msra.mxu0 %v468_v9 }
 0x443   :  { %v7228_v12 = vpop.eup %7227  ;;  %6877 = vmatpush3.msra.mxu1 %v467_v51  ;;  %6883 = vmatprep.mubr.msk.f32.mxu0 %vm7438_vm1, %v7437_v42  ;;  %v1879_v53 = vmul.f32 %v7226_v46, %v7844_v3  ;;  %v469_v3 = vmul.f32 %v7622_v19, %v7661_v29  ;;  %v472_v29 = vmul.f32 %v7526_v59, %v7509_v49  ;;  %v3260_v49 = vld [vmem:[#allocation7 + $0x118] sm:$0xff] }
 0x444   :  { %6891 = vmatprep.subr.mxu0 %v7437_v42  ;;  %v1853_v44 = vpop.xlane.xlu0 %1852  ;;  %6878 = vmatprep.mubr.msk.f32.mxu1 %vm7438_vm1, %v7437_v42  ;;  %v1878_v15 = vmul.f32 %v7228_v12, %v7846_v4 }
 0x445   :  { %7241 = vrcp.f32 %v1853_v44  ;;  %6886 = vmatprep.subr.mxu1 %v7437_v42  ;;  %v1850_v18 = vpop.xlane.xlu1 %1849  ;;  %6884 = vmatmul.mubr.msk.f32.vlgmr.msra.gmra.mxu0 %vm1712_vm12, %v1879_v53 }
 0x446   :  { %v7230_v55 = vpop.eup %7229  ;;  %7243 = vrcp.f32 %v1850_v18  ;;  %6879 = vmatmul.mubr.msk.f32.vlgmr.msra.gmra.mxu1 %vm1712_vm12, %v1878_v15  ;;  %6892 = vmatpush3.msra.mxu0 %v470_v17 }
 0x447   :  { %v7232_v22 = vpop.eup %7231  ;;  %6887 = vmatpush3.msra.mxu1 %v469_v3  ;;  %6888 = vmatprep.mubr.msk.f32.mxu1 %vm7438_vm1, %v7437_v42  ;;  %v1881_v4 = vmul.f32 %v7230_v55, %v7853_v47 }
 0x448   :  { %6893 = vmatprep.mubr.msk.f32.mxu0 %vm7438_vm1, %v7437_v42  ;;  %6896 = vmatprep.subr.mxu1 %v7437_v42  ;;  %v1880_v52 = vmul.f32 %v7232_v22, %v7855_v13 }
 0x449   :  { %6901 = vmatprep.subr.mxu0 %v7437_v42  ;;  %v1856_v24 = vpop.xlane.xlu1 %1855  ;;  %6894 = vmatmul.mubr.msk.f32.vlgmr.msra.gmra.mxu0 %vm1712_vm12, %v1881_v4 }
 0x44a   :  { %v7234_v62 = vpop.eup %7233  ;;  %7245 = vrcp.f32 %v1856_v24  ;;  %6889 = vmatmul.mubr.msk.f32.vlgmr.msra.gmra.mxu1 %vm1712_vm12, %v1880_v52  ;;  %6902 = vmatpush3.msra.mxu0 %v472_v29 }
 0x44b   :  { %v7236_v47 = vpop.eup %7235  ;;  %6897 = vmatpush3.msra.mxu1 %v471_v57  ;;  %6898 = vmatprep.mubr.msk.f32.mxu1 %vm7438_vm1, %v7437_v42  ;;  %v1883_v13 = vmul.f32 %v7234_v62, %v7861_v43 }
 0x44c   :  { %6903 = vmatprep.mubr.msk.f32.mxu0 %vm7438_vm1, %v7437_v42  ;;  %6906 = vmatprep.subr.mxu1 %v7437_v42  ;;  %v1882_v32 = vmul.f32 %v7236_v47, %v7863_v21 }
 0x44d   :  { %6911 = vmatprep.subr.mxu0 %v7437_v42  ;;  %6904 = vmatmul.mubr.msk.f32.vlgmr.msra.gmra.mxu0 %vm1712_vm12, %v1883_v13 }
 0x44e   :  { %v7238_v33 = vpop.eup %7237  ;;  %6899 = vmatmul.mubr.msk.f32.vlgmr.msra.gmra.mxu1 %vm1712_vm12, %v1882_v32  ;;  %6912 = vmatpush3.msra.mxu0 %v474_v5 }
 0x44f   :  { %v7240_v43 = vpop.eup %7239  ;;  %6907 = vmatpush3.msra.mxu1 %v473_v10  ;;  %6908 = vmatprep.mubr.msk.f32.mxu1 %vm7438_vm1, %v7437_v42  ;;  %v1885_v21 = vmul.f32 %v7238_v33, %v7869_v23 }
 0x450   :  { %6913 = vmatprep.mubr.msk.f32.mxu0 %vm7438_vm1, %v7437_v42  ;;  %6916 = vmatprep.subr.mxu1 %v7437_v42  ;;  %v1884_v35 = vmul.f32 %v7240_v43, %v7871_v48 }
 0x451   :  { %6921 = vmatprep.subr.mxu0 %v7437_v42  ;;  %6914 = vmatmul.mubr.msk.f32.vlgmr.msra.gmra.mxu0 %vm1712_vm12, %v1885_v21 }
 0x452   :  { %v7242_v39 = vpop.eup %7241  ;;  %6909 = vmatmul.mubr.msk.f32.vlgmr.msra.gmra.mxu1 %vm1712_vm12, %v1884_v35  ;;  %6922 = vmatpush3.msra.mxu0 %v476_v36 }
 0x453   :  { %v7244_v23 = vpop.eup %7243  ;;  %6917 = vmatpush3.msra.mxu1 %v475_v20  ;;  %6918 = vmatprep.mubr.msk.f32.mxu1 %vm7438_vm1, %v7437_v42  ;;  %v1887_v48 = vmul.f32 %v7242_v39, %v7877_v26 }
 0x454   :  { %6923 = vmatprep.mubr.msk.f32.mxu0 %vm7438_vm1, %v7437_v42  ;;  %6926 = vmatprep.subr.mxu1 %v7437_v42  ;;  %v1886_v40 = vmul.f32 %v7244_v23, %v7879_v27  ;;  %v3073_v27 = vld [vmem:[#allocation7 + $0xb8] sm:$0xff] }
 0x455   :  { %6924 = vmatmul.mubr.msk.f32.vlgmr.msra.gmra.mxu0 %vm1712_vm12, %v1887_v48  ;;  %6931 = vmatprep.subr.mxu0 %v3074_v50 }
 0x456   :  { %6919 = vmatmul.mubr.msk.f32.vlgmr.msra.gmra.mxu1 %vm1712_vm12, %v1886_v40  ;;  %6932 = vmatpush3.msra.mxu0 %v3074_v50  ;;  %v3259_v40 = vld [vmem:[#allocation7 + $0xc8] sm:$0xff]  ;;  %v3167_v50 = vld [vmem:[#allocation7 + $0xc0] sm:$0xff] }
 0x457   :  { %v7246_v45 = vpop.eup %7245  ;;  %6927 = vmatpush3.msra.mxu1 %v477_v41  ;;  %6928 = vmatprep.mubr.msk.f32.mxu1 %vm7438_vm1, %v7437_v42  ;;  %v3258_v41 = vld [vmem:[#allocation7 + $0x78] sm:$0xff] }
 0x458   :  { %v1888_v26 = vmul.f32 %v7246_v45, %v7885_v31  ;;  %6933 = vmatprep.subr.mxu0 %v3073_v27  ;;  %v3168_v45 = vld [vmem:[#allocation7 + $0x110] sm:$0xff] }
 0x459   :  { %6934 = vmatpush3.msra.mxu0 %v3073_v27  ;;  %6942 = vmatprep.subr.mxu1 %v3168_v45  ;;  %v73_v27 = vld [vmem:[#allocation5] sm:$0xff] }
 0x45a   :  { %6929 = vmatmul.mubr.msk.f32.vlgmr.msra.gmra.mxu1 %vm1712_vm12, %v1888_v26  ;;  %6935 = vmatprep.subr.mxu0 %v3072_v25  ;;  %v3257_v26 = vld [vmem:[#allocation7 + $0x28] sm:$0xff] }
 0x45b   :  { %6936 = vmatpush3.msra.mxu0 %v3072_v25  ;;  %6943 = vmatpush3.msra.mxu1 %v3168_v45  ;;  %v74_v25 = vld [vmem:[#allocation5 + $0x8] sm:$0xff] }
 0x45c   :  { %6937 = vmatprep.subr.mxu0 %v3071_v28  ;;  %6944 = vmatprep.subr.mxu1 %v3167_v50 }
 0x45d   :  { %6938 = vmatpush3.msra.mxu0 %v3071_v28  ;;  %v3166_v28 = vld [vmem:[#allocation7 + $0x70] sm:$0xff]  ;;  %6945 = vmatpush3.msra.mxu1 %v3167_v50 }
 0x45e   :  { %6953 = vmatprep.subr.mxu0 %v3260_v49  ;;  %6946 = vmatprep.subr.mxu1 %v3166_v28 }
 0x45f   :  { %6947 = vmatpush3.msra.mxu1 %v3166_v28 }
 0x4f9   :  { %v1958_v54 = vpop.f32.mrf.mxu0 }
 0x4fb   :  { %v6855_v56 = vpop.f32.mrf.mxu0 }
 0x4fc   :  { %v6481_v56 = vld [vmem:[#allocation8 + $0x7] ss:$0 sm:$0xff] }
 0x4fd   :  { %v2104_v30 = vpop.f32.mrf.mxu0 }
 0x4fe   :  { %v2031_v31 = vpop.f32.mrf.mxu1 }
 0x4ff   :  { %v3057_v60 = vadd.f32 %v2031_v31, %v1958_v54  ;;  %v6865_v61 = vpop.f32.mrf.mxu0  ;;  %v3352_v54 = vld [vmem:[#allocation7 + $0x120] sm:$0xff] }
 0x500   :  { %v6860_v63 = vpop.f32.mrf.mxu1 }
 0x501   :  { %v3059_v2 = vadd.f32 %v3057_v60, %v2104_v30  ;;  %v2250_v34 = vpop.f32.mrf.mxu0  ;;  %v7319_v63 = vld [vmem:[#allocation2] sm:$0xff] }
 0x502   :  { %v2177_v37 = vpop.f32.mrf.mxu1 }
 0x503   :  { %v3061_v38 = vadd.f32 %v3059_v2, %v2177_v37  ;;  %v6875_v16 = vpop.f32.mrf.mxu0 }
 0x504   :  { %v6870_v8 = vpop.f32.mrf.mxu1  ;;  %v3350_v16 = vld [vmem:[#allocation7 + $0x80] sm:$0xff] }
 0x505   :  { %v3063_v9 = vadd.f32 %v3061_v38, %v2250_v34  ;;  %v2396_v11 = vpop.f32.mrf.mxu0  ;;  %v7320_v34 = vld [vmem:[#allocation2 + $0x8] sm:$0xff]  ;;  %v3351_v38 = vld [vmem:[#allocation7 + $0xd0] sm:$0xff] }
 0x506   :  { %v2323_v51 = vpop.f32.mrf.mxu1  ;;  %v3349_v8 = vld [vmem:[#allocation7 + $0x30] sm:$0xff] }
 0x507   :  { %v3065_v46 = vadd.f32 %v3063_v9, %v2323_v51  ;;  %v6885_v12 = vpop.f32.mrf.mxu0  ;;  %v6487_v9 = vld [vmem:[#allocation8 + $0x9] ss:$0 sm:$0xff] }
 0x508   :  { %v6880_v53 = vpop.f32.mrf.mxu1 }
 0x509   :  { %v3067_v44 = vadd.f32 %v3065_v46, %v2396_v11  ;;  %v2542_v15 = vpop.f32.mrf.mxu0 }
 0x50a   :  { %v2469_v17 = vpop.f32.mrf.mxu1 }
 0x50b   :  { %v3069_v18 = vadd.f32 %v3067_v44, %v2469_v17  ;;  %v6895_v3 = vpop.f32.mrf.mxu0  ;;  %v6484_v17 = vld [vmem:[#allocation8 + $0x8] ss:$0 sm:$0xff] }
 0x50c   :  { %v6890_v55 = vpop.f32.mrf.mxu1 }
 0x50d   :  { %6939 = vmatprep.mubr.msk.f32.mxu0 %vm120_vm0, %v3069_v18  ;;  %v2688_v22 = vpop.f32.mrf.mxu0 }
 0x50e   :  { %v2615_v4 = vpop.f32.mrf.mxu1 }
 0x50f   :  { %v3058_v52 = vadd.f32 %v2615_v4, %v2542_v15  ;;  %v6905_v29 = vpop.f32.mrf.mxu0 }
 0x510   :  { %v6900_v24 = vpop.f32.mrf.mxu1  ;;  %v8021_v29 = vld [vmem:[#allocation8 + $0xa] ss:$0 sm:$0xff] }
 0x511   :  { %v3060_v57 = vadd.f32 %v3058_v52, %v2688_v22  ;;  %v2834_v62 = vpop.f32.mrf.mxu0 }
 0x512   :  { %v2761_v47 = vpop.f32.mrf.mxu1 }
 0x513   :  { %v3062_v13 = vadd.f32 %v3060_v57, %v2761_v47  ;;  %v6915_v32 = vpop.f32.mrf.mxu0 }
 0x514   :  { %v6910_v5 = vpop.f32.mrf.mxu1 }
 0x515   :  { %v3064_v10 = vadd.f32 %v3062_v13, %v2834_v62  ;;  %v2980_v33 = vpop.f32.mrf.mxu0 }
 0x516   :  { %v2907_v43 = vpop.f32.mrf.mxu1 }
 0x517   :  { %v3066_v21 = vadd.f32 %v3064_v10, %v2907_v43  ;;  %v6925_v35 = vpop.f32.mrf.mxu0 }
 0x518   :  { %v6920_v36 = vpop.f32.mrf.mxu1 }
 0x519   :  { %v3068_v20 = vadd.f32 %v3066_v21, %v2980_v33 }
 0x51a   :  { %v3053_v39 = vpop.f32.mrf.mxu1 }
 0x51b   :  { %v3070_v23 = vadd.f32 %v3068_v20, %v3053_v39 }
 0x51c   :  { %v6930_v48 = vpop.f32.mrf.mxu1 }
 0x51d   :  { %6940 = vmatmul.mubr.msk.f32.vlgmr.msra.gmra.mxu0 %vm120_vm0, %v3070_v23 }
 0x51e   :  { %6954 = vmatpush3.msra.mxu0 %v3260_v49  ;;  %6961 = vmatprep.mubr.msk.f32.mxu0 %vm120_vm0, %v73_v27  ;;  %v3165_v49 = vld [vmem:[#allocation7 + $0x20] sm:$0xff] }
 0x51f   :  { %6955 = vmatprep.subr.mxu0 %v3259_v40  ;;  %6948 = vmatprep.subr.mxu1 %v3165_v49 }
 0x520   :  { %6956 = vmatpush3.msra.mxu0 %v3259_v40  ;;  %6949 = vmatpush3.msra.mxu1 %v3165_v49 }
 0x521   :  { %6957 = vmatprep.subr.mxu0 %v3258_v41  ;;  %6964 = vmatprep.subr.mxu1 %v3352_v54 }
 0x522   :  { %6958 = vmatpush3.msra.mxu0 %v3258_v41 }
 0x523   :  { %6959 = vmatprep.subr.mxu0 %v3257_v26 }
 0x524   :  { %6960 = vmatpush3.msra.mxu0 %v3257_v26 }
 0x525   :  { %6962 = vmatmul.mubr.msk.f32.vlgmr.msra.gmra.mxu0 %vm120_vm0, %v74_v25  ;;  %6975 = vmatprep.subr.mxu0 %v7437_v42 }
 0x526   :  { %6977 = vmatprep.mubr.msk.f32.mxu0 %vm7438_vm1, %v7437_v42 }
 0x5dd   :  { %v6941_v30 = vpop.f32.mrf.mxu0 }
 0x5de   :  { %v3160_v31 = vadd.f32 %v6941_v30, %v6481_v56 }
 0x5df   :  { %v3154_v60 = vpop.f32.mrf.mxu0 }
 0x5e0   :  { %v3155_v61 = vadd.f32 %v6481_v56, %v3154_v60  ;;  %v7998_v37 = vadd.f32 %v7320_v34, %v3160_v31 }
 0x5e2   :  { %v7996_v2 = vadd.f32 %v7319_v63, %v3155_v61 }
 0x5e4   :  { %6950 = vmatprep.mubr.msk.f32.mxu1 %vm120_vm0, %v7996_v2 }
 0x5e5   :  { %6951 = vmatmul.mubr.msk.f32.vlgmr.msra.gmra.mxu1 %vm120_vm0, %v7998_v37  ;;  %v6963_v11 = vpop.f32.mrf.mxu0 }
 0x5e6   :  { %6965 = vmatpush3.msra.mxu1 %v3352_v54  ;;  %6972 = vmatprep.mubr.msk.f32.mxu1 %vm120_vm0, %v73_v27  ;;  %v8009_v51 = vadd.f32 %v6963_v11, %v6487_v9 }
 0x5e7   :  { %6966 = vmatprep.subr.mxu1 %v3351_v38  ;;  %v3340_v46 = vpop.f32.mrf.mxu0 }
 0x5e8   :  { %6967 = vmatpush3.msra.mxu1 %v3351_v38  ;;  %v3341_v12 = vadd.f32 %v6487_v9, %v3340_v46  ;;  %v3459_v20 = vmul.f32 %v7523_v58, %v8009_v51  ;;  %v3460_v39 = vmul.f32 %v7545_v0, %v8009_v51  ;;  %v3461_v40 = vmul.f32 %v7526_v59, %v8009_v51 }
 0x5e9   :  { %6968 = vmatprep.subr.mxu1 %v3350_v16  ;;  %v3462_v41 = vmul.f32 %v7569_v6, %v8009_v51  ;;  %v3463_v50 = vmul.f32 %v7548_v1, %v8009_v51  ;;  %v3464_v27 = vmul.f32 %v7601_v14, %v8009_v51  ;;  %v3465_v49 = vmul.f32 %v7572_v7, %v8009_v51 }
 0x5ea   :  { %6969 = vmatpush3.msra.mxu1 %v3350_v16  ;;  %v3451_v53 = vmul.f32 %v7523_v58, %v3341_v12  ;;  %v3452_v44 = vmul.f32 %v7545_v0, %v3341_v12  ;;  %v3453_v4 = vmul.f32 %v7526_v59, %v3341_v12  ;;  %v3454_v52 = vmul.f32 %v7569_v6, %v3341_v12 }
 0x5eb   :  { %6970 = vmatprep.subr.mxu1 %v3349_v8  ;;  %v3455_v13 = vmul.f32 %v7548_v1, %v3341_v12  ;;  %v3456_v32 = vmul.f32 %v7601_v14, %v3341_v12  ;;  %v3457_v33 = vmul.f32 %v7572_v7, %v3341_v12  ;;  %v3458_v43 = vmul.f32 %v7622_v19, %v3341_v12 }
 0x5ec   :  { %6971 = vmatpush3.msra.mxu1 %v3349_v8  ;;  %6976 = vmatpush3.xpose.msk.msra.mxu0 %vm120_vm0, %v3451_v53  ;;  %v3466_v54 = vmul.f32 %v7622_v19, %v8009_v51 }
 0x5ed   :  { %6980 = vmatprep.subr.mxu1 %v7437_v42  ;;  %6973 = vmatmul.mubr.msk.f32.vlgmr.msra.gmra.mxu1 %vm120_vm0, %v74_v25 }
 0x5ee   :  { %6982 = vmatprep.mubr.msk.f32.mxu1 %vm7438_vm1, %v7437_v42  ;;  %6981 = vmatpush3.xpose.msk.msra.mxu1 %vm120_vm0, %v3452_v44 }
 0x5ef   :  { %6985 = vmatprep.subr.mxu0 %v7437_v42  ;;  %6990 = vmatprep.subr.mxu1 %v7437_v42 }
 0x6a5   :  { %v6952_v15 = vpop.f32.mrf.mxu1 }
 0x6a6   :  { %v3254_v21 = vadd.f32 %v6952_v15, %v6484_v17 }
 0x6a7   :  { %v3248_v18 = vpop.f32.mrf.mxu1 }
 0x6a8   :  { %v3249_v3 = vadd.f32 %v6484_v17, %v3248_v18  ;;  %v3443_v23 = vmul.f32 %v7523_v58, %v3254_v21  ;;  %v3444_v48 = vmul.f32 %v7545_v0, %v3254_v21  ;;  %v3445_v45 = vmul.f32 %v7526_v59, %v3254_v21 }
 0x6a9   :  { %v3446_v26 = vmul.f32 %v7569_v6, %v3254_v21  ;;  %v3447_v25 = vmul.f32 %v7548_v1, %v3254_v21  ;;  %v3448_v28 = vmul.f32 %v7601_v14, %v3254_v21  ;;  %v3449_v56 = vmul.f32 %v7572_v7, %v3254_v21 }
 0x6aa   :  { %v3435_v55 = vmul.f32 %v7523_v58, %v3249_v3  ;;  %v3436_v22 = vmul.f32 %v7545_v0, %v3249_v3  ;;  %v3437_v57 = vmul.f32 %v7526_v59, %v3249_v3  ;;  %v3438_v62 = vmul.f32 %v7569_v6, %v3249_v3 }
 0x6ab   :  { %v3439_v5 = vmul.f32 %v7548_v1, %v3249_v3  ;;  %v3440_v10 = vmul.f32 %v7601_v14, %v3249_v3  ;;  %v3441_v35 = vmul.f32 %v7572_v7, %v3249_v3  ;;  %v3442_v36 = vmul.f32 %v7622_v19, %v3249_v3 }
 0x6ac   :  { %6978 = vmatmul.mubr.msk.f32.vlgmr.msra.gmra.mxu0 %vm120_vm0, %v3435_v55  ;;  %6983 = vmatmul.mubr.msk.f32.vlgmr.msra.gmra.mxu1 %vm120_vm0, %v3436_v22  ;;  %v3450_v30 = vmul.f32 %v7622_v19, %v3254_v21 }
 0x6ad   :  { %6986 = vmatpush3.xpose.msk.msra.mxu0 %vm120_vm0, %v3453_v4  ;;  %6991 = vmatpush3.xpose.msk.msra.mxu1 %vm120_vm0, %v3454_v52  ;;  %v6974_v24 = vpop.f32.mrf.mxu1 }
 0x6ae   :  { %6987 = vmatprep.mubr.msk.f32.mxu0 %vm7438_vm1, %v7437_v42  ;;  %6992 = vmatprep.mubr.msk.f32.mxu1 %vm7438_vm1, %v7437_v42  ;;  %v8034_v47 = vadd.f32 %v6974_v24, %v8021_v29 }
 0x6af   :  { %6995 = vmatprep.subr.mxu0 %v7437_v42  ;;  %7000 = vmatprep.subr.mxu1 %v7437_v42  ;;  %v3426_v31 = vpop.f32.mrf.mxu1 }
 0x6b0   :  { %6988 = vmatmul.mubr.msk.f32.vlgmr.msra.gmra.mxu0 %vm120_vm0, %v3437_v57  ;;  %6993 = vmatmul.mubr.msk.f32.vlgmr.msra.gmra.mxu1 %vm120_vm0, %v3438_v62  ;;  %v8137_v60 = vadd.f32 %v8021_v29, %v3426_v31 }
 0x6b1   :  { %6996 = vmatpush3.xpose.msk.msra.mxu0 %vm120_vm0, %v3455_v13  ;;  %7001 = vmatpush3.xpose.msk.msra.mxu1 %vm120_vm0, %v3456_v32 }
 0x6b2   :  { %6997 = vmatprep.mubr.msk.f32.mxu0 %vm7438_vm1, %v7437_v42  ;;  %7002 = vmatprep.mubr.msk.f32.mxu1 %vm7438_vm1, %v7437_v42  ;;  %v3467_v61 = vmul.f32 %v7523_v58, %v8137_v60  ;;  %v3468_v63 = vmul.f32 %v7545_v0, %v8137_v60 }
 0x6b3   :  { %7005 = vmatprep.subr.mxu0 %v7437_v42  ;;  %7010 = vmatprep.subr.mxu1 %v7437_v42 }
 0x6b4   :  { %6998 = vmatmul.mubr.msk.f32.vlgmr.msra.gmra.mxu0 %vm120_vm0, %v3439_v5  ;;  %7003 = vmatmul.mubr.msk.f32.vlgmr.msra.gmra.mxu1 %vm120_vm0, %v3440_v10 }
 0x6b5   :  { %7006 = vmatpush3.xpose.msk.msra.mxu0 %vm120_vm0, %v3457_v33  ;;  %7011 = vmatpush3.xpose.msk.msra.mxu1 %vm120_vm0, %v3458_v43 }
 0x6b6   :  { %7007 = vmatprep.mubr.msk.f32.mxu0 %vm7438_vm1, %v7437_v42  ;;  %7012 = vmatprep.mubr.msk.f32.mxu1 %vm7438_vm1, %v7437_v42 }
 0x6b7   :  { %7015 = vmatprep.subr.mxu0 %v7437_v42  ;;  %7020 = vmatprep.subr.mxu1 %v7437_v42 }
 0x6b8   :  { %7008 = vmatmul.mubr.msk.f32.vlgmr.msra.gmra.mxu0 %vm120_vm0, %v3441_v35  ;;  %7013 = vmatmul.mubr.msk.f32.vlgmr.msra.gmra.mxu1 %vm120_vm0, %v3442_v36 }
 0x6b9   :  { %7016 = vmatpush3.xpose.msk.msra.mxu0 %vm120_vm0, %v3459_v20  ;;  %7021 = vmatpush3.xpose.msk.msra.mxu1 %vm120_vm0, %v3460_v39 }
 0x6ba   :  { %7017 = vmatprep.mubr.msk.f32.mxu0 %vm7438_vm1, %v7437_v42  ;;  %7022 = vmatprep.mubr.msk.f32.mxu1 %vm7438_vm1, %v7437_v42 }
 0x6bb   :  { %7025 = vmatprep.subr.mxu0 %v7437_v42  ;;  %7030 = vmatprep.subr.mxu1 %v7437_v42 }
 0x6bc   :  { %7018 = vmatmul.mubr.msk.f32.vlgmr.msra.gmra.mxu0 %vm120_vm0, %v3443_v23  ;;  %7023 = vmatmul.mubr.msk.f32.vlgmr.msra.gmra.mxu1 %vm120_vm0, %v3444_v48 }
 0x6bd   :  { %7026 = vmatpush3.xpose.msk.msra.mxu0 %vm120_vm0, %v3461_v40  ;;  %7031 = vmatpush3.xpose.msk.msra.mxu1 %vm120_vm0, %v3462_v41 }
 0x6be   :  { %7027 = vmatprep.mubr.msk.f32.mxu0 %vm7438_vm1, %v7437_v42  ;;  %7032 = vmatprep.mubr.msk.f32.mxu1 %vm7438_vm1, %v7437_v42 }
 0x6bf   :  { %7035 = vmatprep.subr.mxu0 %v7437_v42  ;;  %7040 = vmatprep.subr.mxu1 %v7437_v42 }
 0x6c0   :  { %7028 = vmatmul.mubr.msk.f32.vlgmr.msra.gmra.mxu0 %vm120_vm0, %v3445_v45  ;;  %7033 = vmatmul.mubr.msk.f32.vlgmr.msra.gmra.mxu1 %vm120_vm0, %v3446_v26 }
 0x6c1   :  { %7036 = vmatpush3.xpose.msk.msra.mxu0 %vm120_vm0, %v3463_v50  ;;  %7041 = vmatpush3.xpose.msk.msra.mxu1 %vm120_vm0, %v3464_v27 }
 0x6c2   :  { %7037 = vmatprep.mubr.msk.f32.mxu0 %vm7438_vm1, %v7437_v42  ;;  %7042 = vmatprep.mubr.msk.f32.mxu1 %vm7438_vm1, %v7437_v42 }
 0x6c3   :  { %7045 = vmatprep.subr.mxu0 %v7437_v42  ;;  %7050 = vmatprep.subr.mxu1 %v7437_v42 }
 0x6c4   :  { %7038 = vmatmul.mubr.msk.f32.vlgmr.msra.gmra.mxu0 %vm120_vm0, %v3447_v25  ;;  %7043 = vmatmul.mubr.msk.f32.vlgmr.msra.gmra.mxu1 %vm120_vm0, %v3448_v28 }
 0x6c5   :  { %7046 = vmatpush3.xpose.msk.msra.mxu0 %vm120_vm0, %v3465_v49  ;;  %7051 = vmatpush3.xpose.msk.msra.mxu1 %vm120_vm0, %v3466_v54 }
 0x6c6   :  { %7047 = vmatprep.mubr.msk.f32.mxu0 %vm7438_vm1, %v7437_v42  ;;  %7052 = vmatprep.mubr.msk.f32.mxu1 %vm7438_vm1, %v7437_v42 }
 0x6c7   :  { %7055 = vmatprep.subr.mxu0 %v7437_v42  ;;  %7060 = vmatprep.subr.mxu1 %v7437_v42 }
 0x6c8   :  { %7048 = vmatmul.mubr.msk.f32.vlgmr.msra.gmra.mxu0 %vm120_vm0, %v3449_v56  ;;  %7053 = vmatmul.mubr.msk.f32.vlgmr.msra.gmra.mxu1 %vm120_vm0, %v3450_v30 }
 0x6c9   :  { %7062 = vmatprep.mubr.msk.f32.mxu1 %vm7438_vm1, %v7437_v42  ;;  %7057 = vmatprep.mubr.msk.f32.mxu0 %vm7438_vm1, %v7437_v42 }
 0x6ca   :  { %7056 = vmatpush3.msra.mxu0 %v3467_v61  ;;  %7061 = vmatpush3.msra.mxu1 %v3468_v63 }
 0x6cb   :  { %7070 = vmatprep.subr.mxu1 %v7437_v42  ;;  %7065 = vmatprep.subr.mxu0 %v7437_v42 }
 0x76c   :  { %v8145_v34 = vpop.f32.mrf.mxu0  ;;  %v8147_v38 = vpop.f32.mrf.mxu1 }
 0x76d   :  { %v4702_v16 = vsel %vm1712_vm12, %v8147_v38, -inf  ;;  %v4699_v8 = vsel %vm1712_vm12, %v8145_v34, -inf }
 0x76e   :  { %4703 = vmax.xlane.f32.xlu1 %v4702_v16  ;;  %v6984_v9 = vpop.f32.mrf.mxu1  ;;  %4700 = vmax.xlane.f32.xlu0 %v4699_v8  ;;  %v6979_v11 = vpop.f32.mrf.mxu0 }
 0x770   :  { %v8153_v51 = vpop.f32.mrf.mxu0  ;;  %v8155_v46 = vpop.f32.mrf.mxu1 }
 0x771   :  { %v4708_v12 = vsel %vm1712_vm12, %v8155_v46, -inf  ;;  %v4705_v53 = vsel %vm1712_vm12, %v8153_v51, -inf }
 0x772   :  { %4709 = vmax.xlane.f32.xlu1 %v4708_v12  ;;  %v6994_v44 = vpop.f32.mrf.mxu1  ;;  %4706 = vmax.xlane.f32.xlu0 %v4705_v53  ;;  %v6989_v15 = vpop.f32.mrf.mxu0 }
 0x774   :  { %v8161_v17 = vpop.f32.mrf.mxu0  ;;  %v8163_v18 = vpop.f32.mrf.mxu1 }
 0x775   :  { %v4714_v3 = vsel %vm1712_vm12, %v8163_v18, -inf  ;;  %v4711_v55 = vsel %vm1712_vm12, %v8161_v17, -inf }
 0x776   :  { %4715 = vmax.xlane.f32.xlu1 %v4714_v3  ;;  %v7004_v22 = vpop.f32.mrf.mxu1  ;;  %4712 = vmax.xlane.f32.xlu0 %v4711_v55  ;;  %v6999_v4 = vpop.f32.mrf.mxu0 }
 0x778   :  { %v8169_v52 = vpop.f32.mrf.mxu0  ;;  %v8171_v29 = vpop.f32.mrf.mxu1 }
 0x779   :  { %v4720_v24 = vsel %vm1712_vm12, %v8171_v29, -inf  ;;  %v4717_v57 = vsel %vm1712_vm12, %v8169_v52, -inf }
 0x77a   :  { %4721 = vmax.xlane.f32.xlu1 %v4720_v24  ;;  %v7014_v62 = vpop.f32.mrf.mxu1  ;;  %4718 = vmax.xlane.f32.xlu0 %v4717_v57  ;;  %v7009_v13 = vpop.f32.mrf.mxu0 }
 0x77c   :  { %v8177_v32 = vpop.f32.mrf.mxu0  ;;  %v8179_v5 = vpop.f32.mrf.mxu1 }
 0x77d   :  { %v4726_v10 = vsel %vm1712_vm12, %v8179_v5, -inf  ;;  %v4723_v33 = vsel %vm1712_vm12, %v8177_v32, -inf }
 0x77e   :  { %4727 = vmax.xlane.f32.xlu1 %v4726_v10  ;;  %v7024_v43 = vpop.f32.mrf.mxu1  ;;  %4724 = vmax.xlane.f32.xlu0 %v4723_v33  ;;  %v7019_v21 = vpop.f32.mrf.mxu0 }
 0x780   :  { %v8185_v35 = vpop.f32.mrf.mxu0  ;;  %v8187_v36 = vpop.f32.mrf.mxu1 }
 0x781   :  { %v4732_v20 = vsel %vm1712_vm12, %v8187_v36, -inf  ;;  %v4729_v39 = vsel %vm1712_vm12, %v8185_v35, -inf }
 0x782   :  { %4733 = vmax.xlane.f32.xlu1 %v4732_v20  ;;  %v7034_v23 = vpop.f32.mrf.mxu1  ;;  %4730 = vmax.xlane.f32.xlu0 %v4729_v39  ;;  %v7029_v48 = vpop.f32.mrf.mxu0 }
 0x784   :  { %v8193_v40 = vpop.f32.mrf.mxu0  ;;  %v8195_v41 = vpop.f32.mrf.mxu1 }
 0x785   :  { %v4738_v45 = vsel %vm1712_vm12, %v8195_v41, -inf  ;;  %v4735_v26 = vsel %vm1712_vm12, %v8193_v40, -inf }
 0x786   :  { %4739 = vmax.xlane.f32.xlu1 %v4738_v45  ;;  %v7044_v50 = vpop.f32.mrf.mxu1  ;;  %4736 = vmax.xlane.f32.xlu0 %v4735_v26  ;;  %v7039_v27 = vpop.f32.mrf.mxu0 }
 0x788   :  { %v8201_v25 = vpop.f32.mrf.mxu0  ;;  %v8203_v28 = vpop.f32.mrf.mxu1 }
 0x789   :  { %v4744_v49 = vsel %vm1712_vm12, %v8203_v28, -inf  ;;  %v4741_v54 = vsel %vm1712_vm12, %v8201_v25, -inf }
 0x78a   :  { %4745 = vmax.xlane.f32.xlu1 %v4744_v49  ;;  %v7054_v56 = vpop.f32.mrf.mxu1  ;;  %4742 = vmax.xlane.f32.xlu0 %v4741_v54  ;;  %v7049_v30 = vpop.f32.mrf.mxu0 }
 0x7f7   :  { %v4704_v31 = vpop.xlane.xlu1 %4703  ;;  %v4701_v61 = vpop.xlane.xlu0 %4700 }
 0x7f8   :  { %v4748_v63 = vsub.f32 %v8147_v38, %v4704_v31  ;;  %v4747_v16 = vsub.f32 %v8145_v34, %v4701_v61 }
 0x7fa   :  { %v4765_v8 = vmul.f32 1.442695, %v4748_v63  ;;  %v4763_v9 = vmul.f32 1.442695, %v4747_v16 }
 0x7fb   :  { %v4710_v11 = vpop.xlane.xlu1 %4709  ;;  %v4707_v12 = vpop.xlane.xlu0 %4706 }
 0x7fc   :  { %7247 = vpow2.f32 %v4765_v8  ;;  %v4750_v53 = vsub.f32 %v8155_v46, %v4710_v11  ;;  %v4749_v44 = vsub.f32 %v8153_v51, %v4707_v12 }
 0x7fd   :  { %7249 = vpow2.f32 %v4763_v9 }
 0x7fe   :  { %v4769_v15 = vmul.f32 1.442695, %v4750_v53  ;;  %v4767_v3 = vmul.f32 1.442695, %v4749_v44 }
 0x7ff   :  { %v4716_v55 = vpop.xlane.xlu1 %4715  ;;  %v4713_v22 = vpop.xlane.xlu0 %4712 }
 0x800   :  { %7251 = vpow2.f32 %v4769_v15  ;;  %v4752_v4 = vsub.f32 %v8163_v18, %v4716_v55  ;;  %v4751_v38 = vsub.f32 %v8161_v17, %v4713_v22 }
 0x801   :  { %7253 = vpow2.f32 %v4767_v3 }
 0x802   :  { %v4773_v34 = vmul.f32 1.442695, %v4752_v4  ;;  %v4771_v24 = vmul.f32 1.442695, %v4751_v38 }
 0x803   :  { %v4722_v57 = vpop.xlane.xlu1 %4721  ;;  %v4719_v62 = vpop.xlane.xlu0 %4718 }
 0x804   :  { %7255 = vpow2.f32 %v4773_v34  ;;  %v4754_v46 = vsub.f32 %v8171_v29, %v4722_v57  ;;  %v4753_v51 = vsub.f32 %v8169_v52, %v4719_v62 }
 0x805   :  { %7257 = vpow2.f32 %v4771_v24 }
 0x806   :  { %v4777_v13 = vmul.f32 1.442695, %v4754_v46  ;;  %v4775_v10 = vmul.f32 1.442695, %v4753_v51 }
 0x807   :  { %v4728_v33 = vpop.xlane.xlu1 %4727  ;;  %v4725_v43 = vpop.xlane.xlu0 %4724 }
 0x808   :  { %7259 = vpow2.f32 %v4777_v13  ;;  %v4756_v18 = vsub.f32 %v8179_v5, %v4728_v33  ;;  %v4755_v17 = vsub.f32 %v8177_v32, %v4725_v43 }
 0x809   :  { %v8219_v21 = vpop.eup %7247  ;;  %7261 = vpow2.f32 %v4775_v10 }
 0x80a   :  { %v8221_v20 = vpop.eup %7249  ;;  %v4781_v39 = vmul.f32 1.442695, %v4756_v18  ;;  %v4779_v23 = vmul.f32 1.442695, %v4755_v17  ;;  %v4798_v52 = vsel %vm1712_vm12, %v8219_v21, 0.0 }
 0x80b   :  { %v4734_v29 = vpop.xlane.xlu1 %4733  ;;  %4799 = vadd.xlane.f32.xlu1 %v4798_v52  ;;  %v4731_v48 = vpop.xlane.xlu0 %4730  ;;  %v4795_v45 = vsel %vm1712_vm12, %v8221_v20, 0.0 }
 0x80c   :  { %7263 = vpow2.f32 %v4781_v39  ;;  %v4758_v5 = vsub.f32 %v8187_v36, %v4734_v29  ;;  %v4757_v32 = vsub.f32 %v8185_v35, %v4731_v48  ;;  %4796 = vadd.xlane.f32.xlu0 %v4795_v45 }
 0x80d   :  { %v8229_v26 = vpop.eup %7251  ;;  %7265 = vpow2.f32 %v4779_v23 }
 0x80e   :  { %v8231_v50 = vpop.eup %7253  ;;  %v4785_v27 = vmul.f32 1.442695, %v4758_v5  ;;  %v4783_v49 = vmul.f32 1.442695, %v4757_v32  ;;  %v4804_v54 = vsel %vm1712_vm12, %v8229_v26, 0.0 }
 0x80f   :  { %v4740_v56 = vpop.xlane.xlu1 %4739  ;;  %4805 = vadd.xlane.f32.xlu1 %v4804_v54  ;;  %v4737_v30 = vpop.xlane.xlu0 %4736  ;;  %v4801_v31 = vsel %vm1712_vm12, %v8231_v50, 0.0 }
 0x810   :  { %7267 = vpow2.f32 %v4785_v27  ;;  %v4760_v35 = vsub.f32 %v8195_v41, %v4740_v56  ;;  %v4759_v36 = vsub.f32 %v8193_v40, %v4737_v30  ;;  %4802 = vadd.xlane.f32.xlu0 %v4801_v31 }
 0x811   :  { %v8239_v61 = vpop.eup %7255  ;;  %7269 = vpow2.f32 %v4783_v49 }
 0x812   :  { %v8241_v63 = vpop.eup %7257  ;;  %v4789_v16 = vmul.f32 1.442695, %v4760_v35  ;;  %v4787_v8 = vmul.f32 1.442695, %v4759_v36  ;;  %v4810_v9 = vsel %vm1712_vm12, %v8239_v61, 0.0  ;;  %v3470_v35 = vmul.f32 %v7569_v6, %v8137_v60 }
 0x813   :  { %4811 = vadd.xlane.f32.xlu1 %v4810_v9  ;;  %v4746_v11 = vpop.xlane.xlu1 %4745  ;;  %v4807_v12 = vsel %vm1712_vm12, %v8241_v63, 0.0  ;;  %v4743_v53 = vpop.xlane.xlu0 %4742 }
 0x814   :  { %7271 = vpow2.f32 %v4789_v16  ;;  %v4762_v40 = vsub.f32 %v8203_v28, %v4746_v11  ;;  %4808 = vadd.xlane.f32.xlu0 %v4807_v12  ;;  %v4761_v41 = vsub.f32 %v8201_v25, %v4743_v53  ;;  %v3469_v16 = vmul.f32 %v7526_v59, %v8137_v60 }
 0x815   :  { %v8249_v44 = vpop.eup %7259  ;;  %7273 = vpow2.f32 %v4787_v8  ;;  %v3472_v12 = vmul.f32 %v7601_v14, %v8137_v60 }
 0x816   :  { %v8251_v15 = vpop.eup %7261  ;;  %v4793_v3 = vmul.f32 1.442695, %v4762_v40  ;;  %v4791_v55 = vmul.f32 1.442695, %v4761_v41  ;;  %v4816_v22 = vsel %vm1712_vm12, %v8249_v44, 0.0 }
 0x817   :  { %4817 = vadd.xlane.f32.xlu1 %v4816_v22  ;;  %v4813_v4 = vsel %vm1712_vm12, %v8251_v15, 0.0  ;;  %v3474_v22 = vmul.f32 %v7622_v19, %v8137_v60 }
 0x818   :  { %7275 = vpow2.f32 %v4793_v3  ;;  %4814 = vadd.xlane.f32.xlu0 %v4813_v4 }
 0x819   :  { %v8257_v28 = vpop.eup %7263  ;;  %7277 = vpow2.f32 %v4791_v55 }
 0x81a   :  { %v8259_v25 = vpop.eup %7265  ;;  %v4822_v38 = vsel %vm1712_vm12, %v8257_v28, 0.0 }
 0x81b   :  { %4823 = vadd.xlane.f32.xlu1 %v4822_v38  ;;  %v4819_v34 = vsel %vm1712_vm12, %v8259_v25, 0.0 }
 0x81c   :  { %4820 = vadd.xlane.f32.xlu0 %v4819_v34 }
 0x81d   :  { %v8265_v24 = vpop.eup %7267 }
 0x81e   :  { %v8267_v57 = vpop.eup %7269  ;;  %v4828_v62 = vsel %vm1712_vm12, %v8265_v24, 0.0 }
 0x81f   :  { %4829 = vadd.xlane.f32.xlu1 %v4828_v62  ;;  %v4825_v46 = vsel %vm1712_vm12, %v8267_v57, 0.0 }
 0x820   :  { %4826 = vadd.xlane.f32.xlu0 %v4825_v46  ;;  %v3476_v46 = vmul.f32 %v7545_v0, %v8034_v47 }
 0x821   :  { %v8273_v51 = vpop.eup %7271 }
 0x822   :  { %v8275_v13 = vpop.eup %7273  ;;  %v4834_v10 = vsel %vm1712_vm12, %v8273_v51, 0.0 }
 0x823   :  { %4835 = vadd.xlane.f32.xlu1 %v4834_v10  ;;  %v4831_v33 = vsel %vm1712_vm12, %v8275_v13, 0.0 }
 0x824   :  { %4832 = vadd.xlane.f32.xlu0 %v4831_v33 }
 0x825   :  { %v8281_v43 = vpop.eup %7275 }
 0x826   :  { %v8283_v18 = vpop.eup %7277  ;;  %v4840_v17 = vsel %vm1712_vm12, %v8281_v43, 0.0 }
 0x827   :  { %4841 = vadd.xlane.f32.xlu1 %v4840_v17  ;;  %v4837_v39 = vsel %vm1712_vm12, %v8283_v18, 0.0 }
 0x828   :  { %4838 = vadd.xlane.f32.xlu0 %v4837_v39  ;;  %v3477_v39 = vmul.f32 %v7526_v59, %v8034_v47  ;;  %v3480_v59 = vmul.f32 %v7601_v14, %v8034_v47 }
 0x894   :  { %v4800_v23 = vpop.xlane.xlu1 %4799 }
 0x895   :  { %7279 = vrcp.f32 %v4800_v23  ;;  %v4797_v52 = vpop.xlane.xlu0 %4796 }
 0x896   :  { %7281 = vrcp.f32 %v4797_v52  ;;  %v3479_v52 = vmul.f32 %v7548_v1, %v8034_v47 }
 0x898   :  { %v4806_v29 = vpop.xlane.xlu1 %4805 }
 0x899   :  { %7283 = vrcp.f32 %v4806_v29  ;;  %v4803_v48 = vpop.xlane.xlu0 %4802 }
 0x89a   :  { %7285 = vrcp.f32 %v4803_v48  ;;  %v3481_v48 = vmul.f32 %v7572_v7, %v8034_v47 }
 0x89c   :  { %v4812_v45 = vpop.xlane.xlu1 %4811 }
 0x89d   :  { %7287 = vrcp.f32 %v4812_v45  ;;  %v4809_v5 = vpop.xlane.xlu0 %4808 }
 0x89e   :  { %7289 = vrcp.f32 %v4809_v5  ;;  %v6058_v5 = vld [vmem:[#allocation7 + $0x88] sm:$0xff] }
 0x8a0   :  { %v4818_v32 = vpop.xlane.xlu1 %4817 }
 0x8a1   :  { %7291 = vrcp.f32 %v4818_v32  ;;  %v4815_v27 = vpop.xlane.xlu0 %4814  ;;  %v6057_v32 = vld [vmem:[#allocation7 + $0x38] sm:$0xff] }
 0x8a2   :  { %v7280_v49 = vpop.eup %7279  ;;  %7293 = vrcp.f32 %v4815_v27 }
 0x8a3   :  { %v7282_v54 = vpop.eup %7281  ;;  %v4860_v56 = vmul.f32 %v7280_v49, %v8219_v21 }
 0x8a4   :  { %v4824_v30 = vpop.xlane.xlu1 %4823  ;;  %v4859_v31 = vmul.f32 %v7282_v54, %v8221_v20 }
 0x8a5   :  { %7295 = vrcp.f32 %v4824_v30  ;;  %v4821_v36 = vpop.xlane.xlu0 %4820  ;;  %7063 = vmatmul.mubr.msk.f32.vlgmr.msra.gmra.mxu1 %vm1712_vm12, %v4860_v56 }
 0x8a6   :  { %v7284_v8 = vpop.eup %7283  ;;  %7297 = vrcp.f32 %v4821_v36  ;;  %7058 = vmatmul.mubr.msk.f32.vlgmr.msra.gmra.mxu0 %vm1712_vm12, %v4859_v31  ;;  %7071 = vmatpush3.msra.mxu1 %v3470_v35 }
 0x8a7   :  { %v7286_v9 = vpop.eup %7285  ;;  %7066 = vmatpush3.msra.mxu0 %v3469_v16  ;;  %7072 = vmatprep.mubr.msk.f32.mxu1 %vm7438_vm1, %v7437_v42  ;;  %v4862_v21 = vmul.f32 %v7284_v8, %v8229_v26  ;;  %v3471_v26 = vmul.f32 %v7548_v1, %v8137_v60  ;;  %v3482_v1 = vmul.f32 %v7622_v19, %v8034_v47 }
 0x8a8   :  { %7080 = vmatprep.subr.mxu1 %v7437_v42  ;;  %v4830_v20 = vpop.xlane.xlu1 %4829  ;;  %7067 = vmatprep.mubr.msk.f32.mxu0 %vm7438_vm1, %v7437_v42  ;;  %v4861_v11 = vmul.f32 %v7286_v9, %v8231_v50 }
 0x8a9   :  { %7299 = vrcp.f32 %v4830_v20  ;;  %7075 = vmatprep.subr.mxu0 %v7437_v42  ;;  %v4827_v53 = vpop.xlane.xlu0 %4826  ;;  %7073 = vmatmul.mubr.msk.f32.vlgmr.msra.gmra.mxu1 %vm1712_vm12, %v4862_v21 }
 0x8aa   :  { %v7288_v40 = vpop.eup %7287  ;;  %7301 = vrcp.f32 %v4827_v53  ;;  %7068 = vmatmul.mubr.msk.f32.vlgmr.msra.gmra.mxu0 %vm1712_vm12, %v4861_v11  ;;  %7081 = vmatpush3.msra.mxu1 %v3472_v12 }
 0x8ab   :  { %v7290_v41 = vpop.eup %7289  ;;  %7076 = vmatpush3.msra.mxu0 %v3471_v26  ;;  %7082 = vmatprep.mubr.msk.f32.mxu1 %vm7438_vm1, %v7437_v42  ;;  %v4864_v50 = vmul.f32 %v7288_v40, %v8239_v61  ;;  %v3473_v61 = vmul.f32 %v7572_v7, %v8137_v60  ;;  %v6060_v7 = vld [vmem:[#allocation7 + $0x128] sm:$0xff] }
 0x8ac   :  { %7090 = vmatprep.subr.mxu1 %v7437_v42  ;;  %v4836_v3 = vpop.xlane.xlu1 %4835  ;;  %7077 = vmatprep.mubr.msk.f32.mxu0 %vm7438_vm1, %v7437_v42  ;;  %v4863_v55 = vmul.f32 %v7290_v41, %v8241_v63 }
 0x8ad   :  { %7303 = vrcp.f32 %v4836_v3  ;;  %7085 = vmatprep.subr.mxu0 %v7437_v42  ;;  %v4833_v4 = vpop.xlane.xlu0 %4832  ;;  %7083 = vmatmul.mubr.msk.f32.vlgmr.msra.gmra.mxu1 %vm1712_vm12, %v4864_v50 }
 0x8ae   :  { %v7292_v38 = vpop.eup %7291  ;;  %7305 = vrcp.f32 %v4833_v4  ;;  %7078 = vmatmul.mubr.msk.f32.vlgmr.msra.gmra.mxu0 %vm1712_vm12, %v4863_v55  ;;  %7091 = vmatpush3.msra.mxu1 %v3474_v22 }
 0x8af   :  { %v7294_v34 = vpop.eup %7293  ;;  %7086 = vmatpush3.msra.mxu0 %v3473_v61  ;;  %7092 = vmatprep.mubr.msk.f32.mxu1 %vm7438_vm1, %v7437_v42  ;;  %v4866_v63 = vmul.f32 %v7292_v38, %v8249_v44  ;;  %v3475_v44 = vmul.f32 %v7523_v58, %v8034_v47  ;;  %v3478_v58 = vmul.f32 %v7569_v6, %v8034_v47  ;;  %v6059_v47 = vld [vmem:[#allocation7 + $0xd8] sm:$0xff] }
 0x8b0   :  { %7100 = vmatprep.subr.mxu1 %v7437_v42  ;;  %v4842_v62 = vpop.xlane.xlu1 %4841  ;;  %7087 = vmatprep.mubr.msk.f32.mxu0 %vm7438_vm1, %v7437_v42  ;;  %v4865_v60 = vmul.f32 %v7294_v34, %v8251_v15 }
 0x8b1   :  { %7307 = vrcp.f32 %v4842_v62  ;;  %7095 = vmatprep.subr.mxu0 %v7437_v42  ;;  %v4839_v10 = vpop.xlane.xlu0 %4838  ;;  %7093 = vmatmul.mubr.msk.f32.vlgmr.msra.gmra.mxu1 %vm1712_vm12, %v4866_v63 }
 0x8b2   :  { %v7296_v33 = vpop.eup %7295  ;;  %7309 = vrcp.f32 %v4839_v10  ;;  %7088 = vmatmul.mubr.msk.f32.vlgmr.msra.gmra.mxu0 %vm1712_vm12, %v4865_v60  ;;  %7101 = vmatpush3.msra.mxu1 %v3476_v46 }
 0x8b3   :  { %v7298_v17 = vpop.eup %7297  ;;  %7096 = vmatpush3.msra.mxu0 %v3475_v44  ;;  %7097 = vmatprep.mubr.msk.f32.mxu0 %vm7438_vm1, %v7437_v42  ;;  %v4868_v0 = vmul.f32 %v7296_v33, %v8257_v28 }
 0x8b4   :  { %7102 = vmatprep.mubr.msk.f32.mxu1 %vm7438_vm1, %v7437_v42  ;;  %7105 = vmatprep.subr.mxu0 %v7437_v42  ;;  %v4867_v15 = vmul.f32 %v7298_v17, %v8259_v25 }
 0x8b5   :  { %7110 = vmatprep.subr.mxu1 %v7437_v42  ;;  %7103 = vmatmul.mubr.msk.f32.vlgmr.msra.gmra.mxu1 %vm1712_vm12, %v4868_v0 }
 0x8b6   :  { %v7300_v23 = vpop.eup %7299  ;;  %7098 = vmatmul.mubr.msk.f32.vlgmr.msra.gmra.mxu0 %vm1712_vm12, %v4867_v15  ;;  %7111 = vmatpush3.msra.mxu1 %v3478_v58 }
 0x8b7   :  { %v7302_v28 = vpop.eup %7301  ;;  %7106 = vmatpush3.msra.mxu0 %v3477_v39  ;;  %7107 = vmatprep.mubr.msk.f32.mxu0 %vm7438_vm1, %v7437_v42  ;;  %v4870_v25 = vmul.f32 %v7300_v23, %v8265_v24 }
 0x8b8   :  { %7112 = vmatprep.mubr.msk.f32.mxu1 %vm7438_vm1, %v7437_v42  ;;  %7115 = vmatprep.subr.mxu0 %v7437_v42  ;;  %v4869_v6 = vmul.f32 %v7302_v28, %v8267_v57 }
 0x8b9   :  { %7120 = vmatprep.subr.mxu1 %v7437_v42  ;;  %7113 = vmatmul.mubr.msk.f32.vlgmr.msra.gmra.mxu1 %vm1712_vm12, %v4870_v25 }
 0x8ba   :  { %v7304_v29 = vpop.eup %7303  ;;  %7108 = vmatmul.mubr.msk.f32.vlgmr.msra.gmra.mxu0 %vm1712_vm12, %v4869_v6  ;;  %7121 = vmatpush3.msra.mxu1 %v3480_v59  ;;  %v6541_v59 = vld [vmem:[#allocation8 + $0xb] ss:$0 sm:$0xff] }
 0x8bb   :  { %v7306_v24 = vpop.eup %7305  ;;  %7116 = vmatpush3.msra.mxu0 %v3479_v52  ;;  %7117 = vmatprep.mubr.msk.f32.mxu0 %vm7438_vm1, %v7437_v42  ;;  %v4872_v57 = vmul.f32 %v7304_v29, %v8273_v51 }
 0x8bc   :  { %7122 = vmatprep.mubr.msk.f32.mxu1 %vm7438_vm1, %v7437_v42  ;;  %7125 = vmatprep.subr.mxu0 %v7437_v42  ;;  %v4871_v14 = vmul.f32 %v7306_v24, %v8275_v13 }
 0x8bd   :  { %7130 = vmatprep.subr.mxu1 %v7437_v42  ;;  %7123 = vmatmul.mubr.msk.f32.vlgmr.msra.gmra.mxu1 %vm1712_vm12, %v4872_v57 }
 0x8be   :  { %v7308_v45 = vpop.eup %7307  ;;  %7118 = vmatmul.mubr.msk.f32.vlgmr.msra.gmra.mxu0 %vm1712_vm12, %v4871_v14  ;;  %7131 = vmatpush3.msra.mxu1 %v3482_v1 }
 0x8bf   :  { %v7310_v51 = vpop.eup %7309  ;;  %7126 = vmatpush3.msra.mxu0 %v3481_v48  ;;  %7127 = vmatprep.mubr.msk.f32.mxu0 %vm7438_vm1, %v7437_v42  ;;  %v4874_v13 = vmul.f32 %v7308_v45, %v8281_v43 }
 0x8c0   :  { %7132 = vmatprep.mubr.msk.f32.mxu1 %vm7438_vm1, %v7437_v42  ;;  %v4873_v19 = vmul.f32 %v7310_v51, %v8283_v18  ;;  %7135 = vmatprep.subr.mxu0 %v6060_v7 }
 0x8c1   :  { %7133 = vmatmul.mubr.msk.f32.vlgmr.msra.gmra.mxu1 %vm1712_vm12, %v4874_v13 }
 0x8c2   :  { %7128 = vmatmul.mubr.msk.f32.vlgmr.msra.gmra.mxu0 %vm1712_vm12, %v4873_v19 }
 0x8c3   :  { %7136 = vmatpush3.msra.mxu0 %v6060_v7 }
 0x8c4   :  { %7137 = vmatprep.subr.mxu0 %v6059_v47 }
 0x8c5   :  { %7138 = vmatpush3.msra.mxu0 %v6059_v47 }
 0x8c6   :  { %7139 = vmatprep.subr.mxu0 %v6058_v5 }
 0x8c7   :  { %7140 = vmatpush3.msra.mxu0 %v6058_v5 }
 0x8c8   :  { %7141 = vmatprep.subr.mxu0 %v6057_v32 }
 0x8c9   :  { %7142 = vmatpush3.msra.mxu0 %v6057_v32 }
 0x965   :  { %v5017_v43 = vpop.f32.mrf.mxu1 }
 0x966   :  { %v4944_v42 = vpop.f32.mrf.mxu0 }
 0x967   :  { %v7064_v27 = vpop.f32.mrf.mxu1  ;;  %v6043_v49 = vadd.f32 %v5017_v43, %v4944_v42  ;;  %v6198_v42 = vld [vmem:[#allocation7 + $0x130] sm:$0xff] }
 0x968   :  { %v7059_v18 = vpop.f32.mrf.mxu0  ;;  %v6197_v27 = vld [vmem:[#allocation7 + $0xe0] sm:$0xff]  ;;  %7146 = vmatprep.subr.mxu1 %v6198_v42 }
 0x969   :  { %v5163_v54 = vpop.f32.mrf.mxu1  ;;  %7147 = vmatpush3.msra.mxu1 %v6198_v42  ;;  %v6196_v18 = vld [vmem:[#allocation7 + $0x90] sm:$0xff] }
 0x96a   :  { %v5090_v56 = vpop.f32.mrf.mxu0  ;;  %7148 = vmatprep.subr.mxu1 %v6197_v27 }
 0x96b   :  { %v6045_v30 = vadd.f32 %v6043_v49, %v5090_v56  ;;  %v7074_v31 = vpop.f32.mrf.mxu1  ;;  %7149 = vmatpush3.msra.mxu1 %v6197_v27  ;;  %v6195_v49 = vld [vmem:[#allocation7 + $0x40] sm:$0xff] }
 0x96c   :  { %v7069_v35 = vpop.f32.mrf.mxu0  ;;  %7150 = vmatprep.subr.mxu1 %v6196_v18 }
 0x96d   :  { %v6047_v36 = vadd.f32 %v6045_v30, %v5163_v54  ;;  %v5309_v16 = vpop.f32.mrf.mxu1  ;;  %7151 = vmatpush3.msra.mxu1 %v6196_v18 }
 0x96e   :  { %v5236_v8 = vpop.f32.mrf.mxu0  ;;  %7152 = vmatprep.subr.mxu1 %v6195_v49 }
 0x96f   :  { %v6049_v9 = vadd.f32 %v6047_v36, %v5236_v8  ;;  %v7084_v21 = vpop.f32.mrf.mxu1  ;;  %7153 = vmatpush3.msra.mxu1 %v6195_v49 }
 0x970   :  { %v7079_v20 = vpop.f32.mrf.mxu0 }
 0x971   :  { %v6051_v11 = vadd.f32 %v6049_v9, %v5309_v16  ;;  %v5455_v12 = vpop.f32.mrf.mxu1  ;;  %v6544_v9 = vld [vmem:[#allocation8 + $0x2] ss:$0 sm:$0xff] }
 0x972   :  { %v5382_v53 = vpop.f32.mrf.mxu0 }
 0x973   :  { %v6053_v26 = vadd.f32 %v6051_v11, %v5382_v53  ;;  %v7094_v40 = vpop.f32.mrf.mxu1  ;;  %v6545_v53 = vld [vmem:[#allocation8 + $0x3] ss:$0 sm:$0xff] }
 0x974   :  { %v7089_v41 = vpop.f32.mrf.mxu0 }
 0x975   :  { %v6055_v50 = vadd.f32 %v6053_v26, %v5455_v12  ;;  %v5601_v3 = vpop.f32.mrf.mxu1  ;;  %v6308_v41 = vld [vmem:[#allocation7 + $0x138] sm:$0xff] }
 0x976   :  { %v5528_v55 = vpop.f32.mrf.mxu0  ;;  %7157 = vmatprep.subr.mxu0 %v6308_v41 }
 0x977   :  { %7143 = vmatprep.mubr.msk.f32.mxu0 %vm120_vm0, %v6055_v50  ;;  %v7104_v22 = vpop.f32.mrf.mxu1  ;;  %v6044_v61 = vadd.f32 %v5601_v3, %v5528_v55  ;;  %v6307_v50 = vld [vmem:[#allocation7 + $0xe8] sm:$0xff]  ;;  %v6306_v3 = vld [vmem:[#allocation7 + $0x98] sm:$0xff] }
 0x978   :  { %v7099_v4 = vpop.f32.mrf.mxu0  ;;  %v6305_v55 = vld [vmem:[#allocation7 + $0x48] sm:$0xff] }
 0x979   :  { %v5747_v38 = vpop.f32.mrf.mxu1  ;;  %v6546_v22 = vld [vmem:[#allocation8 + $0xc] ss:$0 sm:$0xff] }
 0x97a   :  { %v5674_v34 = vpop.f32.mrf.mxu0 }
 0x97b   :  { %v6046_v63 = vadd.f32 %v6044_v61, %v5674_v34  ;;  %v7114_v62 = vpop.f32.mrf.mxu1 }
 0x97c   :  { %v7109_v60 = vpop.f32.mrf.mxu0 }
 0x97d   :  { %v6048_v46 = vadd.f32 %v6046_v63, %v5747_v38  ;;  %v5893_v10 = vpop.f32.mrf.mxu1 }
 0x97e   :  { %v5820_v44 = vpop.f32.mrf.mxu0 }
 0x97f   :  { %v6050_v33 = vadd.f32 %v6048_v46, %v5820_v44  ;;  %v7124_v17 = vpop.f32.mrf.mxu1 }
 0x980   :  { %v7119_v0 = vpop.f32.mrf.mxu0 }
 0x981   :  { %v6052_v15 = vadd.f32 %v6050_v33, %v5893_v10  ;;  %v6039_v58 = vpop.f32.mrf.mxu1 }
 0x982   :  { %v5966_v39 = vpop.f32.mrf.mxu0 }
 0x983   :  { %v6054_v23 = vadd.f32 %v6052_v15, %v5966_v39  ;;  %v7134_v28 = vpop.f32.mrf.mxu1 }
 0x984   :  { %v7129_v25 = vpop.f32.mrf.mxu0 }
 0x985   :  { %v6056_v6 = vadd.f32 %v6054_v23, %v6039_v58 }
 0x987   :  { %7144 = vmatmul.mubr.msk.f32.vlgmr.msra.gmra.mxu0 %vm120_vm0, %v6056_v6 }
 0x988   :  { %7158 = vmatpush3.xpose.msra.mxu0 %v6308_v41 }
 0x989   :  { %7159 = vmatprep.subr.mxu0 %v6307_v50 }
 0x98c   :  { %7160 = vmatpush3.xpose.msra.mxu0 %v6307_v50 }
 0x98d   :  { %7161 = vmatprep.subr.mxu0 %v6306_v3 }
 0x990   :  { %7162 = vmatpush3.xpose.msra.mxu0 %v6306_v3 }
 0x991   :  { %7163 = vmatprep.subr.mxu0 %v6305_v55 }
 0x994   :  { %7164 = vmatpush3.xpose.msra.mxu0 %v6305_v55 }
 0xa47   :  { %v7145_v52 = vpop.f32.mrf.mxu0 }
 0xa48   :  { %v6146_v29 = vadd.f32 %v7145_v52, %v6541_v59 }
 0xa49   :  { %v6140_v24 = vpop.f32.mrf.mxu0 }
 0xa4a   :  { %v8392_v57 = vadd.f32 %v6146_v29, %v7998_v37  ;;  %v6141_v14 = vadd.f32 %v6541_v59, %v6140_v24  ;;  %v6549_v29 = vld [vmem:[#allocation8 + $0xd] ss:$0 sm:$0xff] }
 0xa4c   :  { %v8395_v1 = vadd.f32 %v6141_v14, %v7996_v2  ;;  %v6154_v48 = vsel %vm120_vm0, %v8392_v57, 0.0 }
 0xa4d   :  { %6155 = vadd.xlane.f32.xlu1 %v6154_v48 }
 0xa4e   :  { %v6151_v45 = vsel %vm120_vm0, %v8395_v1, 0.0 }
 0xa4f   :  { %6152 = vadd.xlane.f32.xlu0 %v6151_v45 }
 0xad6   :  { %v6156_v51 = vpop.xlane.xlu1 %6155 }
 0xad7   :  { %v6158_v13 = vmul.f32 0.03125, %v6156_v51 }
 0xad8   :  { %v6153_v19 = vpop.xlane.xlu0 %6152 }
 0xad9   :  { %v6160_v7 = vsub.f32 %v8392_v57, %v6158_v13  ;;  %v6157_v47 = vmul.f32 0.03125, %v6153_v19 }
 0xadb   :  { %v6159_v37 = vsub.f32 %v8395_v1, %v6157_v47  ;;  %v6162_v5 = vmul.f32 %v6160_v7, %v6160_v7 }
 0xadd   :  { %v6166_v2 = vsel %vm120_vm0, %v6162_v5, 0.0  ;;  %v6161_v32 = vmul.f32 %v6159_v37, %v6159_v37 }
 0xade   :  { %6167 = vadd.xlane.f32.xlu1 %v6166_v2 }
 0xadf   :  { %v6163_v43 = vsel %vm120_vm0, %v6161_v32, 0.0 }
 0xae0   :  { %6164 = vadd.xlane.f32.xlu0 %v6163_v43 }
 0xb67   :  { %v6168_v54 = vpop.xlane.xlu1 %6167 }
 0xb68   :  { %v6170_v56 = vmul.f32 0.03125, %v6168_v54 }
 0xb69   :  { %v6165_v30 = vpop.xlane.xlu0 %6164 }
 0xb6a   :  { %v6172_v31 = vadd.f32 1e-05, %v6170_v56  ;;  %v6169_v35 = vmul.f32 0.03125, %v6165_v30 }
 0xb6c   :  { %7311 = vrsqrt.f32 %v6172_v31  ;;  %v6171_v36 = vadd.f32 1e-05, %v6169_v35 }
 0xb6e   :  { %7313 = vrsqrt.f32 %v6171_v36 }
 0xb79   :  { %v7312_v16 = vpop.eup %7311 }
 0xb7a   :  { %v6176_v8 = vmul.f32 %v7312_v16, %v6160_v7 }
 0xb7b   :  { %v7314_v21 = vpop.eup %7313 }
 0xb7c   :  { %v6175_v20 = vmul.f32 %v7314_v21, %v6159_v37  ;;  %v6185_v11 = vmul.f32 %v6544_v9, %v6176_v8 }
 0xb7e   :  { %v6184_v12 = vmul.f32 %v6544_v9, %v6175_v20  ;;  %v6194_v40 = vadd.f32 %v6545_v53, %v6185_v11 }
 0xb80   :  { %v6193_v26 = vadd.f32 %v6545_v53, %v6184_v12 }
 0xb82   :  { %7154 = vmatprep.mubr.msk.f32.mxu1 %vm120_vm0, %v6193_v26 }
 0xb83   :  { %7155 = vmatmul.mubr.msk.f32.vlgmr.msra.gmra.mxu1 %vm120_vm0, %v6194_v40 }
 0xc43   :  { %v7156_v4 = vpop.f32.mrf.mxu1 }
 0xc44   :  { %v6284_v61 = vadd.f32 %v7156_v4, %v6546_v22 }
 0xc45   :  { %v6278_v38 = vpop.f32.mrf.mxu1 }
 0xc46   :  { %v6290_v34 = vmul.f32 0.044715, %v6284_v61  ;;  %v6279_v63 = vadd.f32 %v6546_v22, %v6278_v38  ;;  %v6288_v6 = vmul.f32 0.5, %v6284_v61 }
 0xc48   :  { %v6292_v62 = vmul.f32 %v6290_v34, %v6284_v61  ;;  %v6289_v60 = vmul.f32 0.044715, %v6279_v63  ;;  %v6287_v28 = vmul.f32 0.5, %v6279_v63 }
 0xc4a   :  { %v6294_v46 = vmul.f32 %v6292_v62, %v6284_v61  ;;  %v6291_v10 = vmul.f32 %v6289_v60, %v6279_v63 }
 0xc4c   :  { %v6296_v44 = vadd.f32 %v6294_v46, %v6284_v61  ;;  %v6293_v33 = vmul.f32 %v6291_v10, %v6279_v63 }
 0xc4e   :  { %v6295_v17 = vadd.f32 %v6293_v33, %v6279_v63  ;;  %v6298_v0 = vmul.f32 0.7978846, %v6296_v44 }
 0xc50   :  { %v6297_v15 = vmul.f32 0.7978846, %v6295_v17  ;;  %7315 = vtanh.f32 %v6298_v0 }
 0xc52   :  { %7317 = vtanh.f32 %v6297_v15 }
 0xc5d   :  { %v7316_v58 = vpop.eup %7315 }
 0xc5e   :  { %v6302_v23 = vadd.f32 1.0, %v7316_v58 }
 0xc5f   :  { %v7318_v39 = vpop.eup %7317 }
 0xc60   :  { %v6301_v25 = vadd.f32 1.0, %v7318_v39  ;;  %v6304_v52 = vmul.f32 %v6302_v23, %v6288_v6 }
 0xc62   :  { %v6303_v59 = vmul.f32 %v6301_v25, %v6287_v28 }
 0xc64   :  { %7165 = vmatprep.mubr.f32.mxu0 %v6303_v59 }
 0xc65   :  { %7166 = vmatmul.mubr.f32.vlgmr.msra.gmra.mxu0 %v6304_v52 }
 0xd25   :  { %v7167_v24 = vpop.f32.mrf.mxu0 }
 0xd26   :  { %v6388_v14 = vadd.f32 %v7167_v24, %v6549_v29 }
 0xd27   :  { %v6382_v48 = vpop.f32.mrf.mxu0 }
 0xd28   :  { %v6392_v45 = vadd.f32 %v6388_v14, %v8392_v57  ;;  %v6383_v51 = vadd.f32 %v6549_v29, %v6382_v48 }
 0xd2a   :  { %6394 = vst.msk [vmem:[#allocation10 + $0x8] sm:$0xff] %vm120_vm0, %v6392_v45  ;;  %v6391_v13 = vadd.f32 %v6383_v51, %v8395_v1 }
 0xd2c   :  { %6393 = vst.msk [vmem:[#allocation10] sm:$0xff] %vm120_vm0, %v6391_v13 }
 0xd2d   :  { %7412 = shalt.err (!%p7409_p10)
}
 0xd2e   :  { %6406 = dma.vmem_to_hbm [thread:$0]  %s6401_s3, 256, %s8421_s4, [#allocation4], %s7431_s20, %s7431_s20, %s7432_s21  }
 0xd2f   :  { %7427 = dma.done.wait [#allocation4], 256  }
 0xd30   :  { %7428 = vsyncadd [#allocation4], 4294967040 }
 0xd31   :  { %6410 = vsyncpa [#allocation3], 1 }
 0xd32   :  { %6411 = vsyncpa [#allocation6], 1 }
 0xd33   :  { %6412 = vsyncpa [#allocation9], 1 }
 0xd34   :  { %6413 = vsyncpa [#allocation4], 1 }

</bundles_post_ra>
